<compile_context>
chip_gen: v7x
topology: tpu7x:2x2x1
jax: 0.10.0
libtpu: 0.0.40
codegen_flags: <defaults>
</compile_context>

<pallas_src>
import jax
import jax.numpy as jnp
import numpy as np
from jax import lax
from jax.experimental import pallas as pl
from jax.experimental.pallas import tpu as pltpu


def _round_up(x, m):
    return ((x + m - 1) // m) * m


# ----------------------------------------------------------------------------
# Fused Pallas kernel factory
# ----------------------------------------------------------------------------
def _make_robustlog_kernel(num_layers, seq_len, hidden, batch_tile,
                           compute_dtype, unroll):
    T, H, TB = seq_len, hidden, batch_tile
    H4 = 4 * H
    multi = num_layers > 1

    def kernel(*refs):
        # --- unpack refs -----------------------------------------------------
        pos = 0
        xp0_ref = refs[pos]; pos += 1          # (T, TB, 4H)  xp dtype (layer-0 preacts)
        whh0_ref = refs[pos]; pos += 1         # (H, 4H)      compute dtype
        upper = []
        for _ in range(num_layers - 1):
            upper.append((refs[pos], refs[pos + 1], refs[pos + 2]))
            pos += 3                           # W_ih^T, W_hh^T, bias per upper layer
        fcw_ref = refs[pos]; pos += 1          # (H, Kp)      compute dtype
        fcb_ref = refs[pos]; pos += 1          # (1, Kp)      f32
        out_ref = refs[pos]; pos += 1          # (TB, Kp)     f32
        if multi:
            hseq_sc = refs[pos]; pos += 1      # (T*TB, H)    xp dtype  (inter-layer h)
            xp_sc = refs[pos]; pos += 1        # (T*TB, 4H)   xp dtype  (per-layer preacts)

        def run_layer(load_xp, whh_w, write_hseq):
            """Time recurrence; input projections come from load_xp(t)."""
            def step(t, carry):
                h, c = carry
                gates = load_xp(t) + jnp.dot(
                    h.astype(compute_dtype), whh_w,
                    preferred_element_type=jnp.float32)          # (TB, 4H) f32
                # g-gate columns were pre-scaled by 2 in the wrapper, so ONE
                # full-width sigmoid covers all four gates:
                #   tanh(x) = 2 * sigmoid(2x) - 1.
                s = jax.nn.sigmoid(gates)
                i_g = s[:, 0 * H:1 * H]
                f_g = s[:, 1 * H:2 * H]
                g_g = 2.0 * s[:, 2 * H:3 * H] - 1.0
                o_g = s[:, 3 * H:4 * H]
                c_new = f_g * c + i_g * g_g
                h_new = o_g * jnp.tanh(c_new)
                if write_hseq:                                    # static flag
                    start = pl.multiple_of(t * TB, TB)
                    hseq_sc[pl.ds(start, TB), :] = h_new.astype(hseq_sc.dtype)
                return (h_new, c_new)

            h0 = jnp.zeros((TB, H), jnp.float32)
            c0 = jnp.zeros((TB, H), jnp.float32)
            h_last, _ = lax.fori_loop(0, T, step, (h0, c0), unroll=unroll)
            return h_last

        # --- layer 0: input projection was precomputed outside the kernel ----
        h_last = run_layer(lambda t: xp0_ref[t].astype(jnp.float32),
                           whh0_ref[...], write_hseq=multi)

        # --- layers 1..L-1: one big MXU matmul for the projection, then recur
        for li, (wih_ref, whh_ref, b_ref) in enumerate(upper):
            xp = jnp.dot(hseq_sc[...], wih_ref[...],
                         preferred_element_type=jnp.float32) + b_ref[...]
            xp_sc[...] = xp.astype(xp_sc.dtype)
            is_last = (li == num_layers - 2)

            def load_xp(t):
                start = pl.multiple_of(t * TB, TB)
                return xp_sc[pl.ds(start, TB), :].astype(jnp.float32)

            h_last = run_layer(load_xp, whh_ref[...],
                               write_hseq=(not is_last))

        # --- fused final Linear on the last timestep's hidden state ----------
        out_ref[...] = (
            jnp.dot(h_last.astype(compute_dtype), fcw_ref[...],
                    preferred_element_type=jnp.float32)
            + fcb_ref[...]
        )

    return kernel


# ----------------------------------------------------------------------------
# Wrapper
# ----------------------------------------------------------------------------
def robustlog_forward(features0, params, *, compute_dtype=jnp.float32):
    """features0: (B, T, input_size) — equivalent of features[0] in the module."""
    x = features0.astype(jnp.float32)                 # (B, T, D) batch-first
    B, T, D = x.shape
    lstm_params = params["lstm"]
    num_layers = len(lstm_params)
    H = lstm_params[0][1].shape[0]
    H4 = 4 * H
    fc_w_t = params["fc_w_t"]                         # (H, K)
    fc_b = params["fc_b"]                             # (1, K)
    K = fc_w_t.shape[1]
    K_pad = _round_up(K, 128)                         # lane-dense FC output

    cdt = jnp.dtype(compute_dtype)
    xp_dtype = cdt                                    # storage dtype of xp0 / scratch
    sub = 8 if cdt.itemsize >= 4 else 16              # sublane tile (bf16 packs 16)

    # Pre-scale the g-gate (cell candidate) columns by 2 so the kernel can use
    # a single full-width sigmoid per step (tanh(x) = 2*sigmoid(2x) - 1).
    def scale_g(a):
        return a.at[:, 2 * H:3 * H].multiply(2.0)

    scaled = [(scale_g(wih_t), scale_g(whh_t), scale_g(b))
              for (wih_t, whh_t, b) in lstm_params]
    wih0_t, whh0_t, b0 = scaled[0]

    # ---- layer-0 input projection: ONE big matmul, emitted time-major -------
    # Transposing the raw input (T*B*D elems) is cheaper than transposing the
    # (T*B*4H) projection output whenever D <= 4H.
    if D <= H4:
        xt = jnp.transpose(x, (1, 0, 2)).reshape(T * B, D)
        xp0 = (jnp.dot(xt.astype(compute_dtype), wih0_t.astype(compute_dtype),
                       preferred_element_type=jnp.float32) + b0)
        xp0 = xp0.reshape(T, B, H4).astype(xp_dtype)
    else:
        xp0 = (jnp.dot(x.reshape(B * T, D).astype(compute_dtype),
                       wih0_t.astype(compute_dtype),
                       preferred_element_type=jnp.float32) + b0)
        xp0 = jnp.transpose(xp0.reshape(B, T, H4), (1, 0, 2)).astype(xp_dtype)

    # ---- batch-tile selection + VMEM budget ----------------------------------
    xp_isz = jnp.dtype(xp_dtype).itemsize
    w_isz = cdt.itemsize

    def vmem_bytes(tb):
        n = 2 * T * tb * H4 * xp_isz                  # xp0 block (double-buffered)
        if num_layers > 1:
            n += T * tb * H4 * xp_isz                 # xp_sc scratch
            n += T * tb * H * xp_isz                  # hseq scratch
        n += 2 * num_layers * 2 * H * H4 * w_isz      # resident weights (x2 safety)
        n += 2 * num_layers * H4 * 4                  # biases
        n += 2 * (H * K_pad * w_isz + K_pad * 4)      # FC weight + bias
        n += 2 * tb * K_pad * 4                       # output block (double-buffered)
        return n

    if B >= 16:
        TB = _round_up(-(-B // 2), sub)               # >= 2 tiles -> both v7x TCs busy
    else:
        TB = _round_up(B, sub)
    TB = min(TB, 256)                                 # fill the MXU on v5e/v6e
    while TB > sub and vmem_bytes(TB) > 40 * 1024 * 1024:   # headroom for v7x's 64 MiB
        TB = max(sub, _round_up(TB // 2, sub))

    B_pad = _round_up(B, TB)
    if B_pad != B:
        xp0 = jnp.pad(xp0, ((0, 0), (0, B_pad - B), (0, 0)))
    n_btiles = B_pad // TB

    vmem_limit = int(np.clip(int(vmem_bytes(TB) * 1.5) + (2 << 20),
                             16 << 20, 64 << 20))

    # ---- operands / specs -----------------------------------------------------
    operands = [xp0, whh0_t.astype(compute_dtype)]
    in_specs = [
        pl.BlockSpec((T, TB, H4), lambda b: (0, b, 0)),   # layer-0 gate preacts
        pl.BlockSpec((H, H4), lambda b: (0, 0)),          # W_hh^T layer 0
    ]
    for (wih_t, whh_t, b_comb) in scaled[1:]:
        operands += [wih_t.astype(compute_dtype),
                     whh_t.astype(compute_dtype),
                     b_comb.astype(jnp.float32)]
        in_specs += [
            pl.BlockSpec((H, H4), lambda b: (0, 0)),      # W_ih^T
            pl.BlockSpec((H, H4), lambda b: (0, 0)),      # W_hh^T
            pl.BlockSpec((1, H4), lambda b: (0, 0)),      # b_ih + b_hh
        ]

    fc_w_p = jnp.zeros((H, K_pad), jnp.float32).at[:, :K].set(fc_w_t)
    fc_b_p = jnp.zeros((1, K_pad), jnp.float32).at[:, :K].set(fc_b)
    operands += [fc_w_p.astype(compute_dtype), fc_b_p]
    in_specs += [
        pl.BlockSpec((H, K_pad), lambda b: (0, 0)),       # FC weight (lane-padded)
        pl.BlockSpec((1, K_pad), lambda b: (0, 0)),       # FC bias
    ]

    scratch_shapes = []
    if num_layers > 1:
        scratch_shapes = [
            pltpu.VMEM((T * TB, H), xp_dtype),            # inter-layer h sequence (flat)
            pltpu.VMEM((T * TB, H4), xp_dtype),           # per-layer gate preacts (flat)
        ]

    unroll = T if T <= 8 else 8
    kernel = _make_robustlog_kernel(num_layers, T, H, TB, compute_dtype, unroll)

    out = pl.pallas_call(
        kernel,
        out_shape=jax.ShapeDtypeStruct((B_pad, K_pad), jnp.float32),
        grid_spec=pltpu.PrefetchScalarGridSpec(
            num_scalar_prefetch=0,
            grid=(n_btiles,),
            in_specs=in_specs,
            out_specs=pl.BlockSpec((TB, K_pad), lambda b: (b, 0)),
            scratch_shapes=scratch_shapes,
        ),
        compiler_params=pltpu.CompilerParams(
            dimension_semantics=("parallel",),            # batch tiles independent
            vmem_limit_bytes=vmem_limit,
        ),
    )(*operands)
    return out[:B, :K]


# ----------------------------------------------------------------------------
# Deterministic parameter init (PyTorch-style uniform(-1/sqrt(H), 1/sqrt(H)))
# ----------------------------------------------------------------------------
def init_params(key, input_size, hidden_size, num_layers, num_keys):
    bound = 1.0 / np.sqrt(hidden_size)
    params = {"lstm": []}
    for layer in range(num_layers):
        d_in = input_size if layer == 0 else hidden_size
        key, k1, k2, k3, k4 = jax.random.split(key, 5)
        w_ih = jax.random.uniform(k1, (4 * hidden_size, d_in), jnp.float32,
                                  -bound, bound)
        w_hh = jax.random.uniform(k2, (4 * hidden_size, hidden_size), jnp.float32,
                                  -bound, bound)
        b_ih = jax.random.uniform(k3, (4 * hidden_size,), jnp.float32, -bound, bound)
        b_hh = jax.random.uniform(k4, (4 * hidden_size,), jnp.float32, -bound, bound)
        params["lstm"].append((w_ih.T, w_hh.T, (b_ih + b_hh)[None, :]))
    key, k5, k6 = jax.random.split(key, 3)
    fc_bound = 1.0 / np.sqrt(hidden_size)
    fc_w = jax.random.uniform(k5, (num_keys, hidden_size), jnp.float32,
                              -fc_bound, fc_bound)
    fc_b = jax.random.uniform(k6, (num_keys,), jnp.float32, -fc_bound, fc_bound)
    params["fc_w_t"] = fc_w.T
    params["fc_b"] = fc_b[None, :]
    return params


# ----------------------------------------------------------------------------
# Pure-JAX reference (correctness check only — uses plain tanh, unscaled params)
# ----------------------------------------------------------------------------
def robustlog_reference(features0, params):
    x = features0.astype(jnp.float32)                 # (B, T, D)
    B = x.shape[0]
    for (wih_t, whh_t, b_comb) in params["lstm"]:
        H = whh_t.shape[0]
        h0 = jnp.zeros((B, H), jnp.float32)
        c0 = jnp.zeros((B, H), jnp.float32)

        def step(carry, x_t):
            h, c = carry
            gates = x_t @ wih_t + h @ whh_t + b_comb[0]
            i = jax.nn.sigmoid(gates[:, 0 * H:1 * H])
            f = jax.nn.sigmoid(gates[:, 1 * H:2 * H])
            g = jnp.tanh(gates[:, 2 * H:3 * H])
            o = jax.nn.sigmoid(gates[:, 3 * H:4 * H])
            c_new = f * c + i * g
            h_new = o * jnp.tanh(c_new)
            return (h_new, c_new), h_new

        (_, _), h_seq = jax.lax.scan(step, (h0, c0), jnp.transpose(x, (1, 0, 2)))
        x = jnp.transpose(h_seq, (1, 0, 2))           # (B, T, H)
    last_h = x[:, -1, :]
    return last_h @ params["fc_w_t"] + params["fc_b"][0]


# ----------------------------------------------------------------------------
if __name__ == "__main__":
    batch, seq_len = 2, 8
    input_size, hidden_size, num_layers, num_keys = 16, 32, 2, 10

    key = jax.random.PRNGKey(0)
    key, k_x = jax.random.split(key)
    features0 = jax.random.normal(k_x, (batch, seq_len, input_size), jnp.float32)
    params = init_params(key, input_size, hidden_size, num_layers, num_keys)

    ref = jax.block_until_ready(robustlog_reference(features0, params))

    # f32 path: tight tolerance (the tanh(x)=2*sigmoid(2x)-1 identity introduces
    # only ULP-level differences vs the plain-tanh reference).
    out_f32 = jax.block_until_ready(
        robustlog_forward(features0, params, compute_dtype=jnp.float32))
    assert out_f32.shape == (batch, num_keys)
    np.testing.assert_allclose(np.asarray(out_f32), np.asarray(ref),
                               rtol=1e-4, atol=1e-4)

    # bf16 MXU path (bf16 operands, f32 accumulation + f32 gate/cell math).
    out_bf16 = jax.block_until_ready(
        robustlog_forward(features0, params, compute_dtype=jnp.bfloat16))
    np.testing.assert_allclose(np.asarray(out_bf16), np.asarray(ref),
                               rtol=5e-2, atol=5e-2)

    print("KERNEL_OK")
</pallas_src>

<mosaic_0001>
module attributes {stable_mosaic.version = 11 : i64} {
  func.func @kernel(%arg0: i32, %arg1: memref<8x8x128xf32, #tpu.memory_space<vmem>>, %arg2: memref<32x128xf32, #tpu.memory_space<vmem>>, %arg3: memref<32x128xf32, #tpu.memory_space<vmem>>, %arg4: memref<32x128xf32, #tpu.memory_space<vmem>>, %arg5: memref<1x128xf32, #tpu.memory_space<vmem>>, %arg6: memref<32x128xf32, #tpu.memory_space<vmem>>, %arg7: memref<1x128xf32, #tpu.memory_space<vmem>>, %arg8: memref<8x128xf32, #tpu.memory_space<vmem>>, %arg9: memref<64x32xf32, #tpu.memory_space<vmem>>, %arg10: memref<64x128xf32, #tpu.memory_space<vmem>>) attributes {dimension_semantics = [#tpu.dimension_semantics<parallel>], iteration_bounds = array<i64: 1>, scalar_prefetch = 0 : i64, scratch_operands = 2 : i64, tpu.core_type = #tpu.core_type<tc>, window_params = [{transform_indices = @transform_0, window_bounds = array<i64: 8, 8, 128>}, {pipeline_mode = #tpu.pipeline_mode<synchronous>, transform_indices = @transform_1, window_bounds = array<i64: 32, 128>}, {pipeline_mode = #tpu.pipeline_mode<synchronous>, transform_indices = @transform_2, window_bounds = array<i64: 32, 128>}, {pipeline_mode = #tpu.pipeline_mode<synchronous>, transform_indices = @transform_3, window_bounds = array<i64: 32, 128>}, {pipeline_mode = #tpu.pipeline_mode<synchronous>, transform_indices = @transform_4, window_bounds = array<i64: 1, 128>}, {pipeline_mode = #tpu.pipeline_mode<synchronous>, transform_indices = @transform_5, window_bounds = array<i64: 32, 128>}, {pipeline_mode = #tpu.pipeline_mode<synchronous>, transform_indices = @transform_6, window_bounds = array<i64: 1, 128>}, {transform_indices = @transform_7, window_bounds = array<i64: 8, 128>}]} {
    %c0 = arith.constant 0 : index
    %c0_0 = arith.constant 0 : index
    %0 = vector.load %arg2[%c0, %c0_0] : memref<32x128xf32, #tpu.memory_space<vmem>>, vector<32x128xf32>
    %cst = arith.constant 0.000000e+00 : f32
    %1 = vector.broadcast %cst : f32 to vector<8x32xf32>
    %cst_1 = arith.constant 0.000000e+00 : f32
    %2 = vector.broadcast %cst_1 : f32 to vector<8x32xf32>
    %c0_i32 = arith.constant 0 : i32
    %3 = arith.index_cast %c0_i32 : i32 to index
    %c0_2 = arith.constant 0 : index
    %c0_3 = arith.constant 0 : index
    %4 = vector.load %arg1[%3, %c0_2, %c0_3] : memref<8x8x128xf32, #tpu.memory_space<vmem>>, vector<1x8x128xf32>
    %5 = vector.shape_cast %4 : vector<1x8x128xf32> to vector<8x128xf32>
    %cst_4 = arith.constant dense<0.000000e+00> : vector<8x128xf32>
    %6 = tpu.matmul %1, %0, %cst_4 {dimension_numbers = #tpu.dot_dimension_numbers<[1], [0], [0], [1], [0, 0, 1, 1], [], []>} : vector<8x32xf32>, vector<32x128xf32>, vector<8x128xf32> -> vector<8x128xf32>
    %7 = arith.addf %5, %6 : vector<8x128xf32>
    %8 = arith.negf %7 : vector<8x128xf32>
    %9 = math.exp %8 : vector<8x128xf32>
    %cst_5 = arith.constant 1.000000e+00 : f32
    %10 = vector.broadcast %cst_5 : f32 to vector<8x128xf32>
    %11 = arith.addf %10, %9 : vector<8x128xf32>
    %12 = arith.divf %10, %11 : vector<8x128xf32>
    %13 = vector.extract_strided_slice %12 {offsets = [0, 0], sizes = [8, 32], strides = [1, 1]} : vector<8x128xf32> to vector<8x32xf32>
    %14 = vector.extract_strided_slice %12 {offsets = [0, 32], sizes = [8, 32], strides = [1, 1]} : vector<8x128xf32> to vector<8x32xf32>
    %15 = vector.extract_strided_slice %12 {offsets = [0, 64], sizes = [8, 32], strides = [1, 1]} : vector<8x128xf32> to vector<8x32xf32>
    %cst_6 = arith.constant 2.000000e+00 : f32
    %16 = vector.broadcast %cst_6 : f32 to vector<8x32xf32>
    %17 = arith.mulf %16, %15 : vector<8x32xf32>
    %cst_7 = arith.constant 1.000000e+00 : f32
    %18 = vector.broadcast %cst_7 : f32 to vector<8x32xf32>
    %19 = arith.subf %17, %18 : vector<8x32xf32>
    %20 = vector.extract_strided_slice %12 {offsets = [0, 96], sizes = [8, 32], strides = [1, 1]} : vector<8x128xf32> to vector<8x32xf32>
    %21 = arith.mulf %14, %2 : vector<8x32xf32>
    %22 = arith.mulf %13, %19 : vector<8x32xf32>
    %23 = arith.addf %21, %22 : vector<8x32xf32>
    %24 = math.tanh %23 : vector<8x32xf32>
    %25 = arith.mulf %20, %24 : vector<8x32xf32>
    %c8_i32 = arith.constant 8 : i32
    %26 = arith.muli %c0_i32, %c8_i32 : i32
    %27 = tpu.assume_multiple %26, 8 : i32
    %28 = arith.index_cast %27 : i32 to index
    %c0_8 = arith.constant 0 : index
    %29 = vector.load %arg9[%28, %c0_8] : memref<64x32xf32, #tpu.memory_space<vmem>>, vector<8x32xf32>
    tpu.vector_store %arg9[%28, %c0_8], %25 {strides = array<i32>} : memref<64x32xf32, #tpu.memory_space<vmem>>, vector<8x32xf32>,
    %c1_i32 = arith.constant 1 : i32
    %30 = arith.index_cast %c1_i32 : i32 to index
    %c0_9 = arith.constant 0 : index
    %c0_10 = arith.constant 0 : index
    %31 = vector.load %arg1[%30, %c0_9, %c0_10] : memref<8x8x128xf32, #tpu.memory_space<vmem>>, vector<1x8x128xf32>
    %32 = vector.shape_cast %31 : vector<1x8x128xf32> to vector<8x128xf32>
    %cst_11 = arith.constant dense<0.000000e+00> : vector<8x128xf32>
    %33 = tpu.matmul %25, %0, %cst_11 {dimension_numbers = #tpu.dot_dimension_numbers<[1], [0], [0], [1], [0, 0, 1, 1], [], []>} : vector<8x32xf32>, vector<32x128xf32>, vector<8x128xf32> -> vector<8x128xf32>
    %34 = arith.addf %32, %33 : vector<8x128xf32>
    %35 = arith.negf %34 : vector<8x128xf32>
    %36 = math.exp %35 : vector<8x128xf32>
    %cst_12 = arith.constant 1.000000e+00 : f32
    %37 = vector.broadcast %cst_12 : f32 to vector<8x128xf32>
    %38 = arith.addf %37, %36 : vector<8x128xf32>
    %39 = arith.divf %37, %38 : vector<8x128xf32>
    %40 = vector.extract_strided_slice %39 {offsets = [0, 0], sizes = [8, 32], strides = [1, 1]} : vector<8x128xf32> to vector<8x32xf32>
    %41 = vector.extract_strided_slice %39 {offsets = [0, 32], sizes = [8, 32], strides = [1, 1]} : vector<8x128xf32> to vector<8x32xf32>
    %42 = vector.extract_strided_slice %39 {offsets = [0, 64], sizes = [8, 32], strides = [1, 1]} : vector<8x128xf32> to vector<8x32xf32>
    %cst_13 = arith.constant 2.000000e+00 : f32
    %43 = vector.broadcast %cst_13 : f32 to vector<8x32xf32>
    %44 = arith.mulf %43, %42 : vector<8x32xf32>
    %cst_14 = arith.constant 1.000000e+00 : f32
    %45 = vector.broadcast %cst_14 : f32 to vector<8x32xf32>
    %46 = arith.subf %44, %45 : vector<8x32xf32>
    %47 = vector.extract_strided_slice %39 {offsets = [0, 96], sizes = [8, 32], strides = [1, 1]} : vector<8x128xf32> to vector<8x32xf32>
    %48 = arith.mulf %41, %23 : vector<8x32xf32>
    %49 = arith.mulf %40, %46 : vector<8x32xf32>
    %50 = arith.addf %48, %49 : vector<8x32xf32>
    %51 = math.tanh %50 : vector<8x32xf32>
    %52 = arith.mulf %47, %51 : vector<8x32xf32>
    %c8_i32_15 = arith.constant 8 : i32
    %53 = arith.muli %c1_i32, %c8_i32_15 : i32
    %54 = tpu.assume_multiple %53, 8 : i32
    %55 = arith.index_cast %54 : i32 to index
    %c0_16 = arith.constant 0 : index
    %56 = vector.load %arg9[%55, %c0_16] : memref<64x32xf32, #tpu.memory_space<vmem>>, vector<8x32xf32>
    tpu.vector_store %arg9[%55, %c0_16], %52 {strides = array<i32>} : memref<64x32xf32, #tpu.memory_space<vmem>>, vector<8x32xf32>,
    %c2_i32 = arith.constant 2 : i32
    %57 = arith.index_cast %c2_i32 : i32 to index
    %c0_17 = arith.constant 0 : index
    %c0_18 = arith.constant 0 : index
    %58 = vector.load %arg1[%57, %c0_17, %c0_18] : memref<8x8x128xf32, #tpu.memory_space<vmem>>, vector<1x8x128xf32>
    %59 = vector.shape_cast %58 : vector<1x8x128xf32> to vector<8x128xf32>
    %cst_19 = arith.constant dense<0.000000e+00> : vector<8x128xf32>
    %60 = tpu.matmul %52, %0, %cst_19 {dimension_numbers = #tpu.dot_dimension_numbers<[1], [0], [0], [1], [0, 0, 1, 1], [], []>} : vector<8x32xf32>, vector<32x128xf32>, vector<8x128xf32> -> vector<8x128xf32>
    %61 = arith.addf %59, %60 : vector<8x128xf32>
    %62 = arith.negf %61 : vector<8x128xf32>
    %63 = math.exp %62 : vector<8x128xf32>
    %cst_20 = arith.constant 1.000000e+00 : f32
    %64 = vector.broadcast %cst_20 : f32 to vector<8x128xf32>
    %65 = arith.addf %64, %63 : vector<8x128xf32>
    %66 = arith.divf %64, %65 : vector<8x128xf32>
    %67 = vector.extract_strided_slice %66 {offsets = [0, 0], sizes = [8, 32], strides = [1, 1]} : vector<8x128xf32> to vector<8x32xf32>
    %68 = vector.extract_strided_slice %66 {offsets = [0, 32], sizes = [8, 32], strides = [1, 1]} : vector<8x128xf32> to vector<8x32xf32>
    %69 = vector.extract_strided_slice %66 {offsets = [0, 64], sizes = [8, 32], strides = [1, 1]} : vector<8x128xf32> to vector<8x32xf32>
    %cst_21 = arith.constant 2.000000e+00 : f32
    %70 = vector.broadcast %cst_21 : f32 to vector<8x32xf32>
    %71 = arith.mulf %70, %69 : vector<8x32xf32>
    %cst_22 = arith.constant 1.000000e+00 : f32
    %72 = vector.broadcast %cst_22 : f32 to vector<8x32xf32>
    %73 = arith.subf %71, %72 : vector<8x32xf32>
    %74 = vector.extract_strided_slice %66 {offsets = [0, 96], sizes = [8, 32], strides = [1, 1]} : vector<8x128xf32> to vector<8x32xf32>
    %75 = arith.mulf %68, %50 : vector<8x32xf32>
    %76 = arith.mulf %67, %73 : vector<8x32xf32>
    %77 = arith.addf %75, %76 : vector<8x32xf32>
    %78 = math.tanh %77 : vector<8x32xf32>
    %79 = arith.mulf %74, %78 : vector<8x32xf32>
    %c8_i32_23 = arith.constant 8 : i32
    %80 = arith.muli %c2_i32, %c8_i32_23 : i32
    %81 = tpu.assume_multiple %80, 8 : i32
    %82 = arith.index_cast %81 : i32 to index
    %c0_24 = arith.constant 0 : index
    %83 = vector.load %arg9[%82, %c0_24] : memref<64x32xf32, #tpu.memory_space<vmem>>, vector<8x32xf32>
    tpu.vector_store %arg9[%82, %c0_24], %79 {strides = array<i32>} : memref<64x32xf32, #tpu.memory_space<vmem>>, vector<8x32xf32>,
    %c3_i32 = arith.constant 3 : i32
    %84 = arith.index_cast %c3_i32 : i32 to index
    %c0_25 = arith.constant 0 : index
    %c0_26 = arith.constant 0 : index
    %85 = vector.load %arg1[%84, %c0_25, %c0_26] : memref<8x8x128xf32, #tpu.memory_space<vmem>>, vector<1x8x128xf32>
    %86 = vector.shape_cast %85 : vector<1x8x128xf32> to vector<8x128xf32>
    %cst_27 = arith.constant dense<0.000000e+00> : vector<8x128xf32>
    %87 = tpu.matmul %79, %0, %cst_27 {dimension_numbers = #tpu.dot_dimension_numbers<[1], [0], [0], [1], [0, 0, 1, 1], [], []>} : vector<8x32xf32>, vector<32x128xf32>, vector<8x128xf32> -> vector<8x128xf32>
    %88 = arith.addf %86, %87 : vector<8x128xf32>
    %89 = arith.negf %88 : vector<8x128xf32>
    %90 = math.exp %89 : vector<8x128xf32>
    %cst_28 = arith.constant 1.000000e+00 : f32
    %91 = vector.broadcast %cst_28 : f32 to vector<8x128xf32>
    %92 = arith.addf %91, %90 : vector<8x128xf32>
    %93 = arith.divf %91, %92 : vector<8x128xf32>
    %94 = vector.extract_strided_slice %93 {offsets = [0, 0], sizes = [8, 32], strides = [1, 1]} : vector<8x128xf32> to vector<8x32xf32>
    %95 = vector.extract_strided_slice %93 {offsets = [0, 32], sizes = [8, 32], strides = [1, 1]} : vector<8x128xf32> to vector<8x32xf32>
    %96 = vector.extract_strided_slice %93 {offsets = [0, 64], sizes = [8, 32], strides = [1, 1]} : vector<8x128xf32> to vector<8x32xf32>
    %cst_29 = arith.constant 2.000000e+00 : f32
    %97 = vector.broadcast %cst_29 : f32 to vector<8x32xf32>
    %98 = arith.mulf %97, %96 : vector<8x32xf32>
    %cst_30 = arith.constant 1.000000e+00 : f32
    %99 = vector.broadcast %cst_30 : f32 to vector<8x32xf32>
    %100 = arith.subf %98, %99 : vector<8x32xf32>
    %101 = vector.extract_strided_slice %93 {offsets = [0, 96], sizes = [8, 32], strides = [1, 1]} : vector<8x128xf32> to vector<8x32xf32>
    %102 = arith.mulf %95, %77 : vector<8x32xf32>
    %103 = arith.mulf %94, %100 : vector<8x32xf32>
    %104 = arith.addf %102, %103 : vector<8x32xf32>
    %105 = math.tanh %104 : vector<8x32xf32>
    %106 = arith.mulf %101, %105 : vector<8x32xf32>
    %c8_i32_31 = arith.constant 8 : i32
    %107 = arith.muli %c3_i32, %c8_i32_31 : i32
    %108 = tpu.assume_multiple %107, 8 : i32
    %109 = arith.index_cast %108 : i32 to index
    %c0_32 = arith.constant 0 : index
    %110 = vector.load %arg9[%109, %c0_32] : memref<64x32xf32, #tpu.memory_space<vmem>>, vector<8x32xf32>
    tpu.vector_store %arg9[%109, %c0_32], %106 {strides = array<i32>} : memref<64x32xf32, #tpu.memory_space<vmem>>, vector<8x32xf32>,
    %c4_i32 = arith.constant 4 : i32
    %111 = arith.index_cast %c4_i32 : i32 to index
    %c0_33 = arith.constant 0 : index
    %c0_34 = arith.constant 0 : index
    %112 = vector.load %arg1[%111, %c0_33, %c0_34] : memref<8x8x128xf32, #tpu.memory_space<vmem>>, vector<1x8x128xf32>
    %113 = vector.shape_cast %112 : vector<1x8x128xf32> to vector<8x128xf32>
    %cst_35 = arith.constant dense<0.000000e+00> : vector<8x128xf32>
    %114 = tpu.matmul %106, %0, %cst_35 {dimension_numbers = #tpu.dot_dimension_numbers<[1], [0], [0], [1], [0, 0, 1, 1], [], []>} : vector<8x32xf32>, vector<32x128xf32>, vector<8x128xf32> -> vector<8x128xf32>
    %115 = arith.addf %113, %114 : vector<8x128xf32>
    %116 = arith.negf %115 : vector<8x128xf32>
    %117 = math.exp %116 : vector<8x128xf32>
    %cst_36 = arith.constant 1.000000e+00 : f32
    %118 = vector.broadcast %cst_36 : f32 to vector<8x128xf32>
    %119 = arith.addf %118, %117 : vector<8x128xf32>
    %120 = arith.divf %118, %119 : vector<8x128xf32>
    %121 = vector.extract_strided_slice %120 {offsets = [0, 0], sizes = [8, 32], strides = [1, 1]} : vector<8x128xf32> to vector<8x32xf32>
    %122 = vector.extract_strided_slice %120 {offsets = [0, 32], sizes = [8, 32], strides = [1, 1]} : vector<8x128xf32> to vector<8x32xf32>
    %123 = vector.extract_strided_slice %120 {offsets = [0, 64], sizes = [8, 32], strides = [1, 1]} : vector<8x128xf32> to vector<8x32xf32>
    %cst_37 = arith.constant 2.000000e+00 : f32
    %124 = vector.broadcast %cst_37 : f32 to vector<8x32xf32>
    %125 = arith.mulf %124, %123 : vector<8x32xf32>
    %cst_38 = arith.constant 1.000000e+00 : f32
    %126 = vector.broadcast %cst_38 : f32 to vector<8x32xf32>
    %127 = arith.subf %125, %126 : vector<8x32xf32>
    %128 = vector.extract_strided_slice %120 {offsets = [0, 96], sizes = [8, 32], strides = [1, 1]} : vector<8x128xf32> to vector<8x32xf32>
    %129 = arith.mulf %122, %104 : vector<8x32xf32>
    %130 = arith.mulf %121, %127 : vector<8x32xf32>
    %131 = arith.addf %129, %130 : vector<8x32xf32>
    %132 = math.tanh %131 : vector<8x32xf32>
    %133 = arith.mulf %128, %132 : vector<8x32xf32>
    %c8_i32_39 = arith.constant 8 : i32
    %134 = arith.muli %c4_i32, %c8_i32_39 : i32
    %135 = tpu.assume_multiple %134, 8 : i32
    %136 = arith.index_cast %135 : i32 to index
    %c0_40 = arith.constant 0 : index
    %137 = vector.load %arg9[%136, %c0_40] : memref<64x32xf32, #tpu.memory_space<vmem>>, vector<8x32xf32>
    tpu.vector_store %arg9[%136, %c0_40], %133 {strides = array<i32>} : memref<64x32xf32, #tpu.memory_space<vmem>>, vector<8x32xf32>,
    %c5_i32 = arith.constant 5 : i32
    %138 = arith.index_cast %c5_i32 : i32 to index
    %c0_41 = arith.constant 0 : index
    %c0_42 = arith.constant 0 : index
    %139 = vector.load %arg1[%138, %c0_41, %c0_42] : memref<8x8x128xf32, #tpu.memory_space<vmem>>, vector<1x8x128xf32>
    %140 = vector.shape_cast %139 : vector<1x8x128xf32> to vector<8x128xf32>
    %cst_43 = arith.constant dense<0.000000e+00> : vector<8x128xf32>
    %141 = tpu.matmul %133, %0, %cst_43 {dimension_numbers = #tpu.dot_dimension_numbers<[1], [0], [0], [1], [0, 0, 1, 1], [], []>} : vector<8x32xf32>, vector<32x128xf32>, vector<8x128xf32> -> vector<8x128xf32>
    %142 = arith.addf %140, %141 : vector<8x128xf32>
    %143 = arith.negf %142 : vector<8x128xf32>
    %144 = math.exp %143 : vector<8x128xf32>
    %cst_44 = arith.constant 1.000000e+00 : f32
    %145 = vector.broadcast %cst_44 : f32 to vector<8x128xf32>
    %146 = arith.addf %145, %144 : vector<8x128xf32>
    %147 = arith.divf %145, %146 : vector<8x128xf32>
    %148 = vector.extract_strided_slice %147 {offsets = [0, 0], sizes = [8, 32], strides = [1, 1]} : vector<8x128xf32> to vector<8x32xf32>
    %149 = vector.extract_strided_slice %147 {offsets = [0, 32], sizes = [8, 32], strides = [1, 1]} : vector<8x128xf32> to vector<8x32xf32>
    %150 = vector.extract_strided_slice %147 {offsets = [0, 64], sizes = [8, 32], strides = [1, 1]} : vector<8x128xf32> to vector<8x32xf32>
    %cst_45 = arith.constant 2.000000e+00 : f32
    %151 = vector.broadcast %cst_45 : f32 to vector<8x32xf32>
    %152 = arith.mulf %151, %150 : vector<8x32xf32>
    %cst_46 = arith.constant 1.000000e+00 : f32
    %153 = vector.broadcast %cst_46 : f32 to vector<8x32xf32>
    %154 = arith.subf %152, %153 : vector<8x32xf32>
    %155 = vector.extract_strided_slice %147 {offsets = [0, 96], sizes = [8, 32], strides = [1, 1]} : vector<8x128xf32> to vector<8x32xf32>
    %156 = arith.mulf %149, %131 : vector<8x32xf32>
    %157 = arith.mulf %148, %154 : vector<8x32xf32>
    %158 = arith.addf %156, %157 : vector<8x32xf32>
    %159 = math.tanh %158 : vector<8x32xf32>
    %160 = arith.mulf %155, %159 : vector<8x32xf32>
    %c8_i32_47 = arith.constant 8 : i32
    %161 = arith.muli %c5_i32, %c8_i32_47 : i32
    %162 = tpu.assume_multiple %161, 8 : i32
    %163 = arith.index_cast %162 : i32 to index
    %c0_48 = arith.constant 0 : index
    %164 = vector.load %arg9[%163, %c0_48] : memref<64x32xf32, #tpu.memory_space<vmem>>, vector<8x32xf32>
    tpu.vector_store %arg9[%163, %c0_48], %160 {strides = array<i32>} : memref<64x32xf32, #tpu.memory_space<vmem>>, vector<8x32xf32>,
    %c6_i32 = arith.constant 6 : i32
    %165 = arith.index_cast %c6_i32 : i32 to index
    %c0_49 = arith.constant 0 : index
    %c0_50 = arith.constant 0 : index
    %166 = vector.load %arg1[%165, %c0_49, %c0_50] : memref<8x8x128xf32, #tpu.memory_space<vmem>>, vector<1x8x128xf32>
    %167 = vector.shape_cast %166 : vector<1x8x128xf32> to vector<8x128xf32>
    %cst_51 = arith.constant dense<0.000000e+00> : vector<8x128xf32>
    %168 = tpu.matmul %160, %0, %cst_51 {dimension_numbers = #tpu.dot_dimension_numbers<[1], [0], [0], [1], [0, 0, 1, 1], [], []>} : vector<8x32xf32>, vector<32x128xf32>, vector<8x128xf32> -> vector<8x128xf32>
    %169 = arith.addf %167, %168 : vector<8x128xf32>
    %170 = arith.negf %169 : vector<8x128xf32>
    %171 = math.exp %170 : vector<8x128xf32>
    %cst_52 = arith.constant 1.000000e+00 : f32
    %172 = vector.broadcast %cst_52 : f32 to vector<8x128xf32>
    %173 = arith.addf %172, %171 : vector<8x128xf32>
    %174 = arith.divf %172, %173 : vector<8x128xf32>
    %175 = vector.extract_strided_slice %174 {offsets = [0, 0], sizes = [8, 32], strides = [1, 1]} : vector<8x128xf32> to vector<8x32xf32>
    %176 = vector.extract_strided_slice %174 {offsets = [0, 32], sizes = [8, 32], strides = [1, 1]} : vector<8x128xf32> to vector<8x32xf32>
    %177 = vector.extract_strided_slice %174 {offsets = [0, 64], sizes = [8, 32], strides = [1, 1]} : vector<8x128xf32> to vector<8x32xf32>
    %cst_53 = arith.constant 2.000000e+00 : f32
    %178 = vector.broadcast %cst_53 : f32 to vector<8x32xf32>
    %179 = arith.mulf %178, %177 : vector<8x32xf32>
    %cst_54 = arith.constant 1.000000e+00 : f32
    %180 = vector.broadcast %cst_54 : f32 to vector<8x32xf32>
    %181 = arith.subf %179, %180 : vector<8x32xf32>
    %182 = vector.extract_strided_slice %174 {offsets = [0, 96], sizes = [8, 32], strides = [1, 1]} : vector<8x128xf32> to vector<8x32xf32>
    %183 = arith.mulf %176, %158 : vector<8x32xf32>
    %184 = arith.mulf %175, %181 : vector<8x32xf32>
    %185 = arith.addf %183, %184 : vector<8x32xf32>
    %186 = math.tanh %185 : vector<8x32xf32>
    %187 = arith.mulf %182, %186 : vector<8x32xf32>
    %c8_i32_55 = arith.constant 8 : i32
    %188 = arith.muli %c6_i32, %c8_i32_55 : i32
    %189 = tpu.assume_multiple %188, 8 : i32
    %190 = arith.index_cast %189 : i32 to index
    %c0_56 = arith.constant 0 : index
    %191 = vector.load %arg9[%190, %c0_56] : memref<64x32xf32, #tpu.memory_space<vmem>>, vector<8x32xf32>
    tpu.vector_store %arg9[%190, %c0_56], %187 {strides = array<i32>} : memref<64x32xf32, #tpu.memory_space<vmem>>, vector<8x32xf32>,
    %c7_i32 = arith.constant 7 : i32
    %192 = arith.index_cast %c7_i32 : i32 to index
    %c0_57 = arith.constant 0 : index
    %c0_58 = arith.constant 0 : index
    %193 = vector.load %arg1[%192, %c0_57, %c0_58] : memref<8x8x128xf32, #tpu.memory_space<vmem>>, vector<1x8x128xf32>
    %194 = vector.shape_cast %193 : vector<1x8x128xf32> to vector<8x128xf32>
    %cst_59 = arith.constant dense<0.000000e+00> : vector<8x128xf32>
    %195 = tpu.matmul %187, %0, %cst_59 {dimension_numbers = #tpu.dot_dimension_numbers<[1], [0], [0], [1], [0, 0, 1, 1], [], []>} : vector<8x32xf32>, vector<32x128xf32>, vector<8x128xf32> -> vector<8x128xf32>
    %196 = arith.addf %194, %195 : vector<8x128xf32>
    %197 = arith.negf %196 : vector<8x128xf32>
    %198 = math.exp %197 : vector<8x128xf32>
    %cst_60 = arith.constant 1.000000e+00 : f32
    %199 = vector.broadcast %cst_60 : f32 to vector<8x128xf32>
    %200 = arith.addf %199, %198 : vector<8x128xf32>
    %201 = arith.divf %199, %200 : vector<8x128xf32>
    %202 = vector.extract_strided_slice %201 {offsets = [0, 0], sizes = [8, 32], strides = [1, 1]} : vector<8x128xf32> to vector<8x32xf32>
    %203 = vector.extract_strided_slice %201 {offsets = [0, 32], sizes = [8, 32], strides = [1, 1]} : vector<8x128xf32> to vector<8x32xf32>
    %204 = vector.extract_strided_slice %201 {offsets = [0, 64], sizes = [8, 32], strides = [1, 1]} : vector<8x128xf32> to vector<8x32xf32>
    %cst_61 = arith.constant 2.000000e+00 : f32
    %205 = vector.broadcast %cst_61 : f32 to vector<8x32xf32>
    %206 = arith.mulf %205, %204 : vector<8x32xf32>
    %cst_62 = arith.constant 1.000000e+00 : f32
    %207 = vector.broadcast %cst_62 : f32 to vector<8x32xf32>
    %208 = arith.subf %206, %207 : vector<8x32xf32>
    %209 = vector.extract_strided_slice %201 {offsets = [0, 96], sizes = [8, 32], strides = [1, 1]} : vector<8x128xf32> to vector<8x32xf32>
    %210 = arith.mulf %203, %185 : vector<8x32xf32>
    %211 = arith.mulf %202, %208 : vector<8x32xf32>
    %212 = arith.addf %210, %211 : vector<8x32xf32>
    %213 = math.tanh %212 : vector<8x32xf32>
    %214 = arith.mulf %209, %213 : vector<8x32xf32>
    %c8_i32_63 = arith.constant 8 : i32
    %215 = arith.muli %c7_i32, %c8_i32_63 : i32
    %216 = tpu.assume_multiple %215, 8 : i32
    %217 = arith.index_cast %216 : i32 to index
    %c0_64 = arith.constant 0 : index
    %218 = vector.load %arg9[%217, %c0_64] : memref<64x32xf32, #tpu.memory_space<vmem>>, vector<8x32xf32>
    tpu.vector_store %arg9[%217, %c0_64], %214 {strides = array<i32>} : memref<64x32xf32, #tpu.memory_space<vmem>>, vector<8x32xf32>,
    %c8_i32_65 = arith.constant 8 : i32
    %c0_66 = arith.constant 0 : index
    %c0_67 = arith.constant 0 : index
    %219 = vector.load %arg9[%c0_66, %c0_67] : memref<64x32xf32, #tpu.memory_space<vmem>>, vector<64x32xf32>
    %c0_68 = arith.constant 0 : index
    %c0_69 = arith.constant 0 : index
    %220 = vector.load %arg3[%c0_68, %c0_69] : memref<32x128xf32, #tpu.memory_space<vmem>>, vector<32x128xf32>
    %cst_70 = arith.constant dense<0.000000e+00> : vector<64x128xf32>
    %221 = tpu.matmul %219, %220, %cst_70 {dimension_numbers = #tpu.dot_dimension_numbers<[1], [0], [0], [1], [0, 0, 1, 1], [], []>} : vector<64x32xf32>, vector<32x128xf32>, vector<64x128xf32> -> vector<64x128xf32>
    %c0_71 = arith.constant 0 : index
    %c0_72 = arith.constant 0 : index
    %222 = vector.load %arg5[%c0_71, %c0_72] : memref<1x128xf32, #tpu.memory_space<vmem>>, vector<1x128xf32>
    %223 = vector.broadcast %222 : vector<1x128xf32> to vector<64x128xf32>
    %224 = arith.addf %221, %223 : vector<64x128xf32>
    %c0_73 = arith.constant 0 : index
    %c0_74 = arith.constant 0 : index
    %225 = vector.load %arg10[%c0_73, %c0_74] : memref<64x128xf32, #tpu.memory_space<vmem>>, vector<64x128xf32>
    tpu.vector_store %arg10[%c0_73, %c0_74], %224 {strides = array<i32>} : memref<64x128xf32, #tpu.memory_space<vmem>>, vector<64x128xf32>,
    %c0_75 = arith.constant 0 : index
    %c0_76 = arith.constant 0 : index
    %226 = vector.load %arg4[%c0_75, %c0_76] : memref<32x128xf32, #tpu.memory_space<vmem>>, vector<32x128xf32>
    %cst_77 = arith.constant 0.000000e+00 : f32
    %227 = vector.broadcast %cst_77 : f32 to vector<8x32xf32>
    %cst_78 = arith.constant 0.000000e+00 : f32
    %228 = vector.broadcast %cst_78 : f32 to vector<8x32xf32>
    %c0_i32_79 = arith.constant 0 : i32
    %c8_i32_80 = arith.constant 8 : i32
    %229 = arith.muli %c0_i32_79, %c8_i32_80 : i32
    %230 = tpu.assume_multiple %229, 8 : i32
    %231 = arith.index_cast %230 : i32 to index
    %c0_81 = arith.constant 0 : index
    %232 = vector.load %arg10[%231, %c0_81] : memref<64x128xf32, #tpu.memory_space<vmem>>, vector<8x128xf32>
    %cst_82 = arith.constant dense<0.000000e+00> : vector<8x128xf32>
    %233 = tpu.matmul %227, %226, %cst_82 {dimension_numbers = #tpu.dot_dimension_numbers<[1], [0], [0], [1], [0, 0, 1, 1], [], []>} : vector<8x32xf32>, vector<32x128xf32>, vector<8x128xf32> -> vector<8x128xf32>
    %234 = arith.addf %232, %233 : vector<8x128xf32>
    %235 = arith.negf %234 : vector<8x128xf32>
    %236 = math.exp %235 : vector<8x128xf32>
    %cst_83 = arith.constant 1.000000e+00 : f32
    %237 = vector.broadcast %cst_83 : f32 to vector<8x128xf32>
    %238 = arith.addf %237, %236 : vector<8x128xf32>
    %239 = arith.divf %237, %238 : vector<8x128xf32>
    %240 = vector.extract_strided_slice %239 {offsets = [0, 0], sizes = [8, 32], strides = [1, 1]} : vector<8x128xf32> to vector<8x32xf32>
    %241 = vector.extract_strided_slice %239 {offsets = [0, 32], sizes = [8, 32], strides = [1, 1]} : vector<8x128xf32> to vector<8x32xf32>
    %242 = vector.extract_strided_slice %239 {offsets = [0, 64], sizes = [8, 32], strides = [1, 1]} : vector<8x128xf32> to vector<8x32xf32>
    %cst_84 = arith.constant 2.000000e+00 : f32
    %243 = vector.broadcast %cst_84 : f32 to vector<8x32xf32>
    %244 = arith.mulf %243, %242 : vector<8x32xf32>
    %cst_85 = arith.constant 1.000000e+00 : f32
    %245 = vector.broadcast %cst_85 : f32 to vector<8x32xf32>
    %246 = arith.subf %244, %245 : vector<8x32xf32>
    %247 = vector.extract_strided_slice %239 {offsets = [0, 96], sizes = [8, 32], strides = [1, 1]} : vector<8x128xf32> to vector<8x32xf32>
    %248 = arith.mulf %241, %228 : vector<8x32xf32>
    %249 = arith.mulf %240, %246 : vector<8x32xf32>
    %250 = arith.addf %248, %249 : vector<8x32xf32>
    %251 = math.tanh %250 : vector<8x32xf32>
    %252 = arith.mulf %247, %251 : vector<8x32xf32>
    %c1_i32_86 = arith.constant 1 : i32
    %c8_i32_87 = arith.constant 8 : i32
    %253 = arith.muli %c1_i32_86, %c8_i32_87 : i32
    %254 = tpu.assume_multiple %253, 8 : i32
    %255 = arith.index_cast %254 : i32 to index
    %c0_88 = arith.constant 0 : index
    %256 = vector.load %arg10[%255, %c0_88] : memref<64x128xf32, #tpu.memory_space<vmem>>, vector<8x128xf32>
    %cst_89 = arith.constant dense<0.000000e+00> : vector<8x128xf32>
    %257 = tpu.matmul %252, %226, %cst_89 {dimension_numbers = #tpu.dot_dimension_numbers<[1], [0], [0], [1], [0, 0, 1, 1], [], []>} : vector<8x32xf32>, vector<32x128xf32>, vector<8x128xf32> -> vector<8x128xf32>
    %258 = arith.addf %256, %257 : vector<8x128xf32>
    %259 = arith.negf %258 : vector<8x128xf32>
    %260 = math.exp %259 : vector<8x128xf32>
    %cst_90 = arith.constant 1.000000e+00 : f32
    %261 = vector.broadcast %cst_90 : f32 to vector<8x128xf32>
    %262 = arith.addf %261, %260 : vector<8x128xf32>
    %263 = arith.divf %261, %262 : vector<8x128xf32>
    %264 = vector.extract_strided_slice %263 {offsets = [0, 0], sizes = [8, 32], strides = [1, 1]} : vector<8x128xf32> to vector<8x32xf32>
    %265 = vector.extract_strided_slice %263 {offsets = [0, 32], sizes = [8, 32], strides = [1, 1]} : vector<8x128xf32> to vector<8x32xf32>
    %266 = vector.extract_strided_slice %263 {offsets = [0, 64], sizes = [8, 32], strides = [1, 1]} : vector<8x128xf32> to vector<8x32xf32>
    %cst_91 = arith.constant 2.000000e+00 : f32
    %267 = vector.broadcast %cst_91 : f32 to vector<8x32xf32>
    %268 = arith.mulf %267, %266 : vector<8x32xf32>
    %cst_92 = arith.constant 1.000000e+00 : f32
    %269 = vector.broadcast %cst_92 : f32 to vector<8x32xf32>
    %270 = arith.subf %268, %269 : vector<8x32xf32>
    %271 = vector.extract_strided_slice %263 {offsets = [0, 96], sizes = [8, 32], strides = [1, 1]} : vector<8x128xf32> to vector<8x32xf32>
    %272 = arith.mulf %265, %250 : vector<8x32xf32>
    %273 = arith.mulf %264, %270 : vector<8x32xf32>
    %274 = arith.addf %272, %273 : vector<8x32xf32>
    %275 = math.tanh %274 : vector<8x32xf32>
    %276 = arith.mulf %271, %275 : vector<8x32xf32>
    %c2_i32_93 = arith.constant 2 : i32
    %c8_i32_94 = arith.constant 8 : i32
    %277 = arith.muli %c2_i32_93, %c8_i32_94 : i32
    %278 = tpu.assume_multiple %277, 8 : i32
    %279 = arith.index_cast %278 : i32 to index
    %c0_95 = arith.constant 0 : index
    %280 = vector.load %arg10[%279, %c0_95] : memref<64x128xf32, #tpu.memory_space<vmem>>, vector<8x128xf32>
    %cst_96 = arith.constant dense<0.000000e+00> : vector<8x128xf32>
    %281 = tpu.matmul %276, %226, %cst_96 {dimension_numbers = #tpu.dot_dimension_numbers<[1], [0], [0], [1], [0, 0, 1, 1], [], []>} : vector<8x32xf32>, vector<32x128xf32>, vector<8x128xf32> -> vector<8x128xf32>
    %282 = arith.addf %280, %281 : vector<8x128xf32>
    %283 = arith.negf %282 : vector<8x128xf32>
    %284 = math.exp %283 : vector<8x128xf32>
    %cst_97 = arith.constant 1.000000e+00 : f32
    %285 = vector.broadcast %cst_97 : f32 to vector<8x128xf32>
    %286 = arith.addf %285, %284 : vector<8x128xf32>
    %287 = arith.divf %285, %286 : vector<8x128xf32>
    %288 = vector.extract_strided_slice %287 {offsets = [0, 0], sizes = [8, 32], strides = [1, 1]} : vector<8x128xf32> to vector<8x32xf32>
    %289 = vector.extract_strided_slice %287 {offsets = [0, 32], sizes = [8, 32], strides = [1, 1]} : vector<8x128xf32> to vector<8x32xf32>
    %290 = vector.extract_strided_slice %287 {offsets = [0, 64], sizes = [8, 32], strides = [1, 1]} : vector<8x128xf32> to vector<8x32xf32>
    %cst_98 = arith.constant 2.000000e+00 : f32
    %291 = vector.broadcast %cst_98 : f32 to vector<8x32xf32>
    %292 = arith.mulf %291, %290 : vector<8x32xf32>
    %cst_99 = arith.constant 1.000000e+00 : f32
    %293 = vector.broadcast %cst_99 : f32 to vector<8x32xf32>
    %294 = arith.subf %292, %293 : vector<8x32xf32>
    %295 = vector.extract_strided_slice %287 {offsets = [0, 96], sizes = [8, 32], strides = [1, 1]} : vector<8x128xf32> to vector<8x32xf32>
    %296 = arith.mulf %289, %274 : vector<8x32xf32>
    %297 = arith.mulf %288, %294 : vector<8x32xf32>
    %298 = arith.addf %296, %297 : vector<8x32xf32>
    %299 = math.tanh %298 : vector<8x32xf32>
    %300 = arith.mulf %295, %299 : vector<8x32xf32>
    %c3_i32_100 = arith.constant 3 : i32
    %c8_i32_101 = arith.constant 8 : i32
    %301 = arith.muli %c3_i32_100, %c8_i32_101 : i32
    %302 = tpu.assume_multiple %301, 8 : i32
    %303 = arith.index_cast %302 : i32 to index
    %c0_102 = arith.constant 0 : index
    %304 = vector.load %arg10[%303, %c0_102] : memref<64x128xf32, #tpu.memory_space<vmem>>, vector<8x128xf32>
    %cst_103 = arith.constant dense<0.000000e+00> : vector<8x128xf32>
    %305 = tpu.matmul %300, %226, %cst_103 {dimension_numbers = #tpu.dot_dimension_numbers<[1], [0], [0], [1], [0, 0, 1, 1], [], []>} : vector<8x32xf32>, vector<32x128xf32>, vector<8x128xf32> -> vector<8x128xf32>
    %306 = arith.addf %304, %305 : vector<8x128xf32>
    %307 = arith.negf %306 : vector<8x128xf32>
    %308 = math.exp %307 : vector<8x128xf32>
    %cst_104 = arith.constant 1.000000e+00 : f32
    %309 = vector.broadcast %cst_104 : f32 to vector<8x128xf32>
    %310 = arith.addf %309, %308 : vector<8x128xf32>
    %311 = arith.divf %309, %310 : vector<8x128xf32>
    %312 = vector.extract_strided_slice %311 {offsets = [0, 0], sizes = [8, 32], strides = [1, 1]} : vector<8x128xf32> to vector<8x32xf32>
    %313 = vector.extract_strided_slice %311 {offsets = [0, 32], sizes = [8, 32], strides = [1, 1]} : vector<8x128xf32> to vector<8x32xf32>
    %314 = vector.extract_strided_slice %311 {offsets = [0, 64], sizes = [8, 32], strides = [1, 1]} : vector<8x128xf32> to vector<8x32xf32>
    %cst_105 = arith.constant 2.000000e+00 : f32
    %315 = vector.broadcast %cst_105 : f32 to vector<8x32xf32>
    %316 = arith.mulf %315, %314 : vector<8x32xf32>
    %cst_106 = arith.constant 1.000000e+00 : f32
    %317 = vector.broadcast %cst_106 : f32 to vector<8x32xf32>
    %318 = arith.subf %316, %317 : vector<8x32xf32>
    %319 = vector.extract_strided_slice %311 {offsets = [0, 96], sizes = [8, 32], strides = [1, 1]} : vector<8x128xf32> to vector<8x32xf32>
    %320 = arith.mulf %313, %298 : vector<8x32xf32>
    %321 = arith.mulf %312, %318 : vector<8x32xf32>
    %322 = arith.addf %320, %321 : vector<8x32xf32>
    %323 = math.tanh %322 : vector<8x32xf32>
    %324 = arith.mulf %319, %323 : vector<8x32xf32>
    %c4_i32_107 = arith.constant 4 : i32
    %c8_i32_108 = arith.constant 8 : i32
    %325 = arith.muli %c4_i32_107, %c8_i32_108 : i32
    %326 = tpu.assume_multiple %325, 8 : i32
    %327 = arith.index_cast %326 : i32 to index
    %c0_109 = arith.constant 0 : index
    %328 = vector.load %arg10[%327, %c0_109] : memref<64x128xf32, #tpu.memory_space<vmem>>, vector<8x128xf32>
    %cst_110 = arith.constant dense<0.000000e+00> : vector<8x128xf32>
    %329 = tpu.matmul %324, %226, %cst_110 {dimension_numbers = #tpu.dot_dimension_numbers<[1], [0], [0], [1], [0, 0, 1, 1], [], []>} : vector<8x32xf32>, vector<32x128xf32>, vector<8x128xf32> -> vector<8x128xf32>
    %330 = arith.addf %328, %329 : vector<8x128xf32>
    %331 = arith.negf %330 : vector<8x128xf32>
    %332 = math.exp %331 : vector<8x128xf32>
    %cst_111 = arith.constant 1.000000e+00 : f32
    %333 = vector.broadcast %cst_111 : f32 to vector<8x128xf32>
    %334 = arith.addf %333, %332 : vector<8x128xf32>
    %335 = arith.divf %333, %334 : vector<8x128xf32>
    %336 = vector.extract_strided_slice %335 {offsets = [0, 0], sizes = [8, 32], strides = [1, 1]} : vector<8x128xf32> to vector<8x32xf32>
    %337 = vector.extract_strided_slice %335 {offsets = [0, 32], sizes = [8, 32], strides = [1, 1]} : vector<8x128xf32> to vector<8x32xf32>
    %338 = vector.extract_strided_slice %335 {offsets = [0, 64], sizes = [8, 32], strides = [1, 1]} : vector<8x128xf32> to vector<8x32xf32>
    %cst_112 = arith.constant 2.000000e+00 : f32
    %339 = vector.broadcast %cst_112 : f32 to vector<8x32xf32>
    %340 = arith.mulf %339, %338 : vector<8x32xf32>
    %cst_113 = arith.constant 1.000000e+00 : f32
    %341 = vector.broadcast %cst_113 : f32 to vector<8x32xf32>
    %342 = arith.subf %340, %341 : vector<8x32xf32>
    %343 = vector.extract_strided_slice %335 {offsets = [0, 96], sizes = [8, 32], strides = [1, 1]} : vector<8x128xf32> to vector<8x32xf32>
    %344 = arith.mulf %337, %322 : vector<8x32xf32>
    %345 = arith.mulf %336, %342 : vector<8x32xf32>
    %346 = arith.addf %344, %345 : vector<8x32xf32>
    %347 = math.tanh %346 : vector<8x32xf32>
    %348 = arith.mulf %343, %347 : vector<8x32xf32>
    %c5_i32_114 = arith.constant 5 : i32
    %c8_i32_115 = arith.constant 8 : i32
    %349 = arith.muli %c5_i32_114, %c8_i32_115 : i32
    %350 = tpu.assume_multiple %349, 8 : i32
    %351 = arith.index_cast %350 : i32 to index
    %c0_116 = arith.constant 0 : index
    %352 = vector.load %arg10[%351, %c0_116] : memref<64x128xf32, #tpu.memory_space<vmem>>, vector<8x128xf32>
    %cst_117 = arith.constant dense<0.000000e+00> : vector<8x128xf32>
    %353 = tpu.matmul %348, %226, %cst_117 {dimension_numbers = #tpu.dot_dimension_numbers<[1], [0], [0], [1], [0, 0, 1, 1], [], []>} : vector<8x32xf32>, vector<32x128xf32>, vector<8x128xf32> -> vector<8x128xf32>
    %354 = arith.addf %352, %353 : vector<8x128xf32>
    %355 = arith.negf %354 : vector<8x128xf32>
    %356 = math.exp %355 : vector<8x128xf32>
    %cst_118 = arith.constant 1.000000e+00 : f32
    %357 = vector.broadcast %cst_118 : f32 to vector<8x128xf32>
    %358 = arith.addf %357, %356 : vector<8x128xf32>
    %359 = arith.divf %357, %358 : vector<8x128xf32>
    %360 = vector.extract_strided_slice %359 {offsets = [0, 0], sizes = [8, 32], strides = [1, 1]} : vector<8x128xf32> to vector<8x32xf32>
    %361 = vector.extract_strided_slice %359 {offsets = [0, 32], sizes = [8, 32], strides = [1, 1]} : vector<8x128xf32> to vector<8x32xf32>
    %362 = vector.extract_strided_slice %359 {offsets = [0, 64], sizes = [8, 32], strides = [1, 1]} : vector<8x128xf32> to vector<8x32xf32>
    %cst_119 = arith.constant 2.000000e+00 : f32
    %363 = vector.broadcast %cst_119 : f32 to vector<8x32xf32>
    %364 = arith.mulf %363, %362 : vector<8x32xf32>
    %cst_120 = arith.constant 1.000000e+00 : f32
    %365 = vector.broadcast %cst_120 : f32 to vector<8x32xf32>
    %366 = arith.subf %364, %365 : vector<8x32xf32>
    %367 = vector.extract_strided_slice %359 {offsets = [0, 96], sizes = [8, 32], strides = [1, 1]} : vector<8x128xf32> to vector<8x32xf32>
    %368 = arith.mulf %361, %346 : vector<8x32xf32>
    %369 = arith.mulf %360, %366 : vector<8x32xf32>
    %370 = arith.addf %368, %369 : vector<8x32xf32>
    %371 = math.tanh %370 : vector<8x32xf32>
    %372 = arith.mulf %367, %371 : vector<8x32xf32>
    %c6_i32_121 = arith.constant 6 : i32
    %c8_i32_122 = arith.constant 8 : i32
    %373 = arith.muli %c6_i32_121, %c8_i32_122 : i32
    %374 = tpu.assume_multiple %373, 8 : i32
    %375 = arith.index_cast %374 : i32 to index
    %c0_123 = arith.constant 0 : index
    %376 = vector.load %arg10[%375, %c0_123] : memref<64x128xf32, #tpu.memory_space<vmem>>, vector<8x128xf32>
    %cst_124 = arith.constant dense<0.000000e+00> : vector<8x128xf32>
    %377 = tpu.matmul %372, %226, %cst_124 {dimension_numbers = #tpu.dot_dimension_numbers<[1], [0], [0], [1], [0, 0, 1, 1], [], []>} : vector<8x32xf32>, vector<32x128xf32>, vector<8x128xf32> -> vector<8x128xf32>
    %378 = arith.addf %376, %377 : vector<8x128xf32>
    %379 = arith.negf %378 : vector<8x128xf32>
    %380 = math.exp %379 : vector<8x128xf32>
    %cst_125 = arith.constant 1.000000e+00 : f32
    %381 = vector.broadcast %cst_125 : f32 to vector<8x128xf32>
    %382 = arith.addf %381, %380 : vector<8x128xf32>
    %383 = arith.divf %381, %382 : vector<8x128xf32>
    %384 = vector.extract_strided_slice %383 {offsets = [0, 0], sizes = [8, 32], strides = [1, 1]} : vector<8x128xf32> to vector<8x32xf32>
    %385 = vector.extract_strided_slice %383 {offsets = [0, 32], sizes = [8, 32], strides = [1, 1]} : vector<8x128xf32> to vector<8x32xf32>
    %386 = vector.extract_strided_slice %383 {offsets = [0, 64], sizes = [8, 32], strides = [1, 1]} : vector<8x128xf32> to vector<8x32xf32>
    %cst_126 = arith.constant 2.000000e+00 : f32
    %387 = vector.broadcast %cst_126 : f32 to vector<8x32xf32>
    %388 = arith.mulf %387, %386 : vector<8x32xf32>
    %cst_127 = arith.constant 1.000000e+00 : f32
    %389 = vector.broadcast %cst_127 : f32 to vector<8x32xf32>
    %390 = arith.subf %388, %389 : vector<8x32xf32>
    %391 = vector.extract_strided_slice %383 {offsets = [0, 96], sizes = [8, 32], strides = [1, 1]} : vector<8x128xf32> to vector<8x32xf32>
    %392 = arith.mulf %385, %370 : vector<8x32xf32>
    %393 = arith.mulf %384, %390 : vector<8x32xf32>
    %394 = arith.addf %392, %393 : vector<8x32xf32>
    %395 = math.tanh %394 : vector<8x32xf32>
    %396 = arith.mulf %391, %395 : vector<8x32xf32>
    %c7_i32_128 = arith.constant 7 : i32
    %c8_i32_129 = arith.constant 8 : i32
    %397 = arith.muli %c7_i32_128, %c8_i32_129 : i32
    %398 = tpu.assume_multiple %397, 8 : i32
    %399 = arith.index_cast %398 : i32 to index
    %c0_130 = arith.constant 0 : index
    %400 = vector.load %arg10[%399, %c0_130] : memref<64x128xf32, #tpu.memory_space<vmem>>, vector<8x128xf32>
    %cst_131 = arith.constant dense<0.000000e+00> : vector<8x128xf32>
    %401 = tpu.matmul %396, %226, %cst_131 {dimension_numbers = #tpu.dot_dimension_numbers<[1], [0], [0], [1], [0, 0, 1, 1], [], []>} : vector<8x32xf32>, vector<32x128xf32>, vector<8x128xf32> -> vector<8x128xf32>
    %402 = arith.addf %400, %401 : vector<8x128xf32>
    %403 = arith.negf %402 : vector<8x128xf32>
    %404 = math.exp %403 : vector<8x128xf32>
    %cst_132 = arith.constant 1.000000e+00 : f32
    %405 = vector.broadcast %cst_132 : f32 to vector<8x128xf32>
    %406 = arith.addf %405, %404 : vector<8x128xf32>
    %407 = arith.divf %405, %406 : vector<8x128xf32>
    %408 = vector.extract_strided_slice %407 {offsets = [0, 0], sizes = [8, 32], strides = [1, 1]} : vector<8x128xf32> to vector<8x32xf32>
    %409 = vector.extract_strided_slice %407 {offsets = [0, 32], sizes = [8, 32], strides = [1, 1]} : vector<8x128xf32> to vector<8x32xf32>
    %410 = vector.extract_strided_slice %407 {offsets = [0, 64], sizes = [8, 32], strides = [1, 1]} : vector<8x128xf32> to vector<8x32xf32>
    %cst_133 = arith.constant 2.000000e+00 : f32
    %411 = vector.broadcast %cst_133 : f32 to vector<8x32xf32>
    %412 = arith.mulf %411, %410 : vector<8x32xf32>
    %cst_134 = arith.constant 1.000000e+00 : f32
    %413 = vector.broadcast %cst_134 : f32 to vector<8x32xf32>
    %414 = arith.subf %412, %413 : vector<8x32xf32>
    %415 = vector.extract_strided_slice %407 {offsets = [0, 96], sizes = [8, 32], strides = [1, 1]} : vector<8x128xf32> to vector<8x32xf32>
    %416 = arith.mulf %409, %394 : vector<8x32xf32>
    %417 = arith.mulf %408, %414 : vector<8x32xf32>
    %418 = arith.addf %416, %417 : vector<8x32xf32>
    %419 = math.tanh %418 : vector<8x32xf32>
    %420 = arith.mulf %415, %419 : vector<8x32xf32>
    %c8_i32_135 = arith.constant 8 : i32
    %c0_136 = arith.constant 0 : index
    %c0_137 = arith.constant 0 : index
    %421 = vector.load %arg6[%c0_136, %c0_137] : memref<32x128xf32, #tpu.memory_space<vmem>>, vector<32x128xf32>
    %cst_138 = arith.constant dense<0.000000e+00> : vector<8x128xf32>
    %422 = tpu.matmul %420, %421, %cst_138 {dimension_numbers = #tpu.dot_dimension_numbers<[1], [0], [0], [1], [0, 0, 1, 1], [], []>} : vector<8x32xf32>, vector<32x128xf32>, vector<8x128xf32> -> vector<8x128xf32>
    %c0_139 = arith.constant 0 : index
    %c0_140 = arith.constant 0 : index
    %423 = vector.load %arg7[%c0_139, %c0_140] : memref<1x128xf32, #tpu.memory_space<vmem>>, vector<1x128xf32>
    %424 = vector.broadcast %423 : vector<1x128xf32> to vector<8x128xf32>
    %425 = arith.addf %422, %424 : vector<8x128xf32>
    %c0_141 = arith.constant 0 : index
    %c0_142 = arith.constant 0 : index
    %426 = vector.load %arg8[%c0_141, %c0_142] : memref<8x128xf32, #tpu.memory_space<vmem>>, vector<8x128xf32>
    tpu.vector_store %arg8[%c0_141, %c0_142], %425 {strides = array<i32>} : memref<8x128xf32, #tpu.memory_space<vmem>>, vector<8x128xf32>,
    return
  }
  func.func @transform_0(%arg0: i32) -> (i32, i32, i32) {
    %c0_i32 = arith.constant 0 : i32
    %c0_i32_0 = arith.constant 0 : i32
    %c0_i32_1 = arith.constant 0 : i32
    return %c0_i32, %arg0, %c0_i32_0 : i32, i32, i32
  }
  func.func @transform_1(%arg0: i32) -> (i32, i32) {
    %c0_i32 = arith.constant 0 : i32
    %c0_i32_0 = arith.constant 0 : i32
    %c0_i32_1 = arith.constant 0 : i32
    return %c0_i32, %c0_i32_0 : i32, i32
  }
  func.func @transform_2(%arg0: i32) -> (i32, i32) {
    %c0_i32 = arith.constant 0 : i32
    %c0_i32_0 = arith.constant 0 : i32
    %c0_i32_1 = arith.constant 0 : i32
    return %c0_i32, %c0_i32_0 : i32, i32
  }
  func.func @transform_3(%arg0: i32) -> (i32, i32) {
    %c0_i32 = arith.constant 0 : i32
    %c0_i32_0 = arith.constant 0 : i32
    %c0_i32_1 = arith.constant 0 : i32
    return %c0_i32, %c0_i32_0 : i32, i32
  }
  func.func @transform_4(%arg0: i32) -> (i32, i32) {
    %c0_i32 = arith.constant 0 : i32
    %c0_i32_0 = arith.constant 0 : i32
    %c0_i32_1 = arith.constant 0 : i32
    return %c0_i32, %c0_i32_0 : i32, i32
  }
  func.func @transform_5(%arg0: i32) -> (i32, i32) {
    %c0_i32 = arith.constant 0 : i32
    %c0_i32_0 = arith.constant 0 : i32
    %c0_i32_1 = arith.constant 0 : i32
    return %c0_i32, %c0_i32_0 : i32, i32
  }
  func.func @transform_6(%arg0: i32) -> (i32, i32) {
    %c0_i32 = arith.constant 0 : i32
    %c0_i32_0 = arith.constant 0 : i32
    %c0_i32_1 = arith.constant 0 : i32
    return %c0_i32, %c0_i32_0 : i32, i32
  }
  func.func @transform_7(%arg0: i32) -> (i32, i32) {
    %c0_i32 = arith.constant 0 : i32
    %c0_i32_0 = arith.constant 0 : i32
    return %arg0, %c0_i32 : i32, i32
  }
}

</mosaic_0001>

<bundles_post_ra>
// kernel: tpu_custom_call.1
= control target key start
LH: loop header
LB: loop body
LE: loop exit
PB: predicated region body
PF: predicated region fallthrough
CT: control target
= control target key end

     0   :  { %12 = vsyncpa [#allocation5], 0  ;;  %s3149_s0 = inlined_call_operand.hbm [shape: f32[8,8,128], index: 0, kind: input, shape index: {}]   ;;  %s3150_s1 = inlined_call_operand.hbm [shape: f32[32,128], index: 1, kind: input, shape index: {}]   ;;  %s3151_s2 = inlined_call_operand.hbm [shape: f32[32,128], index: 2, kind: input, shape index: {}]   ;;  %s3152_s3 = inlined_call_operand.hbm [shape: f32[32,128], index: 3, kind: input, shape index: {}]   ;;  %s3153_s4 = inlined_call_operand.vmem [shape: f32[1,128], index: 4, kind: input, shape index: {}]   ;;  %s3154_s5 = inlined_call_operand.hbm [shape: f32[32,128], index: 5, kind: input, shape index: {}]   ;;  %s3155_s6 = inlined_call_operand.vmem [shape: f32[1,128], index: 6, kind: input, shape index: {}]   ;;  %s3156_s7 = inlined_call_operand.hbm [shape: f32[8,128], index: 7, kind: output, shape index: {}]  }
   0x1   :  { %13 = vsyncpa [#allocation8], 0 }
   0x2   :  { %14 = vsyncpa [#allocation11], 0 }
   0x3   :  { %15 = vsyncpa [#allocation6], 0  ;;  %s2749_s24 = smov [#allocation7]   ;;  %s2750_s26 = smov [#allocation10]  }
   0x4   :  { %s33_s25 = sshll.u32 %s2749_s24, 4  ;;  %s57_s27 = sshll.u32 %s2750_s26, 4  ;;  %s34_s25 = int_to_ptr.vmem [resolvable:$true] %s33_s25  ;;  %s2802_s27 = int_to_ptr.vmem [resolvable:$true] %s57_s27 }
   0x5   :  { %s2609_s30 = scalar_lea.hbm %s3150_s1, 512 }
   0x6   :  { %p2610_p0 = scmp.ne.s32.totalorder %s3150_s1, %s2609_s30  ;;  %p2613_p1 = scmp.lt.u32.totalorder %s2609_s30, %s3150_s1 }
   0x8   :  { %p2615_p2 = pnand %p2613_p1, %p2610_p0 }
   0xa   :  { %2618 = shalt.err (!%p2615_p2)
}
   0xb   :  { %s2619_s12 = scalar_lea.vmem %s34_s25, 512  ;;  %p2624_p4 = scmp.lt.s32.totalorder %s34_s25, %s34_s25 }
   0xc   :  { %p2620_p3 = scmp.ne.s32.totalorder %s34_s25, %s2619_s12  ;;  %p2625_p5 = scmp.lt.s32.totalorder %s2619_s12, %s2619_s12 }
   0xe   :  { %p2626_p6 = por %p2625_p5, %p2624_p4 }
  0x10   :  { %p2627_p7 = pnand %p2626_p6, %p2620_p3 }
  0x12   :  { %2630 = shalt.err (!%p2627_p7)
}
  0x13   :  { %s2751_s13 = smov 128   ;;  %s2752_s14 = smov 8  }
  0x14   :  { %39 = dma.hbm_to_vmem [thread:$0]  %s3150_s1, 512, %s34_s25, [#allocation8], %s2751_s13, %s2751_s13, %s2752_s14  }
  0x15   :  { %s2631_s19 = scalar_lea.hbm %s3152_s3, 512 }
  0x16   :  { %p2632_p8 = scmp.ne.s32.totalorder %s3152_s3, %s2631_s19  ;;  %p2635_p9 = scmp.lt.u32.totalorder %s2631_s19, %s3152_s3 }
  0x18   :  { %p2637_p10 = pnand %p2635_p9, %p2632_p8 }
  0x1a   :  { %2640 = shalt.err (!%p2637_p10)
}
  0x1b   :  { %s2641_s24 = scalar_lea.vmem %s2802_s27, 512  ;;  %p2646_p12 = scmp.lt.s32.totalorder %s2802_s27, %s2802_s27 }
  0x1c   :  { %p2642_p11 = scmp.ne.s32.totalorder %s2802_s27, %s2641_s24  ;;  %p2647_p13 = scmp.lt.s32.totalorder %s2641_s24, %s2641_s24 }
  0x1e   :  { %p2648_p0 = por %p2647_p13, %p2646_p12 }
  0x20   :  { %p2649_p1 = pnand %p2648_p0, %p2642_p11 }
  0x22   :  { %2652 = shalt.err (!%p2649_p1)
}
  0x23   :  { %63 = dma.hbm_to_vmem [thread:$0]  %s3152_s3, 512, %s2802_s27, [#allocation11], %s2751_s13, %s2751_s13, %s2752_s14  }
  0x24   :  { %s2753_s26 = smov [#allocation4]   ;;  %s2754_s29 = smov [#allocation9]  }
  0x25   :  { %s21_s28 = sshll.u32 %s2753_s26, 4  ;;  %s45_s30 = sshll.u32 %s2754_s29, 4  ;;  %s22_s28 = int_to_ptr.vmem [resolvable:$true] %s21_s28  ;;  %s2839_s30 = int_to_ptr.vmem [resolvable:$true] %s45_s30 }
  0x26   :  { %s2653_s10 = scalar_lea.hbm %s3149_s0, 1024 }
  0x27   :  { %p2654_p2 = scmp.ne.s32.totalorder %s3149_s0, %s2653_s10  ;;  %p2657_p3 = scmp.lt.u32.totalorder %s2653_s10, %s3149_s0 }
  0x29   :  { %p2659_p4 = pnand %p2657_p3, %p2654_p2 }
  0x2b   :  { %2662 = shalt.err (!%p2659_p4)
}
  0x2c   :  { %s2663_s3 = scalar_lea.vmem %s22_s28, 1024  ;;  %p2668_p6 = scmp.lt.s32.totalorder %s22_s28, %s22_s28 }
  0x2d   :  { %p2664_p5 = scmp.ne.s32.totalorder %s22_s28, %s2663_s3  ;;  %p2669_p7 = scmp.lt.s32.totalorder %s2663_s3, %s2663_s3 }
  0x2f   :  { %p2670_p8 = por %p2669_p7, %p2668_p6 }
  0x31   :  { %p2671_p9 = pnand %p2670_p8, %p2664_p5 }
  0x33   :  { %2674 = shalt.err (!%p2671_p9)
}
  0x34   :  { %27 = dma.hbm_to_vmem [thread:$0]  %s3149_s0, 1024, %s22_s28, [#allocation5], %s2751_s13, %s2751_s13, %s2752_s14  }
  0x35   :  { %s2675_s20 = scalar_lea.hbm %s3151_s2, 512 }
  0x36   :  { %p2676_p10 = scmp.ne.s32.totalorder %s3151_s2, %s2675_s20  ;;  %p2679_p11 = scmp.lt.u32.totalorder %s2675_s20, %s3151_s2 }
  0x38   :  { %p2681_p12 = pnand %p2679_p11, %p2676_p10 }
  0x3a   :  { %2684 = shalt.err (!%p2681_p12)
}
  0x3b   :  { %s2685_s1 = scalar_lea.vmem %s2839_s30, 512  ;;  %p2690_p0 = scmp.lt.s32.totalorder %s2839_s30, %s2839_s30 }
  0x3c   :  { %p2686_p13 = scmp.ne.s32.totalorder %s2839_s30, %s2685_s1  ;;  %p2691_p1 = scmp.lt.s32.totalorder %s2685_s1, %s2685_s1 }
  0x3e   :  { %p2692_p2 = por %p2691_p1, %p2690_p0 }
  0x40   :  { %p2693_p3 = pnand %p2692_p2, %p2686_p13 }
  0x42   :  { %2696 = shalt.err (!%p2693_p3)
}
  0x43   :  { %51 = dma.hbm_to_vmem [thread:$0]  %s3151_s2, 512, %s2839_s30, [#allocation8], %s2751_s13, %s2751_s13, %s2752_s14  }
  0x44   :  { %s2755_s26 = smov [#allocation12]   ;;  %s2697_s9 = scalar_lea.hbm %s3154_s5, 512 }
  0x45   :  { %s71_s28 = sshll.u32 %s2755_s26, 4  ;;  %p2698_p4 = scmp.ne.s32.totalorder %s3154_s5, %s2697_s9  ;;  %s72_s28 = int_to_ptr.vmem [resolvable:$true] %s71_s28 }
  0x46   :  { %p2701_p5 = scmp.lt.u32.totalorder %s2697_s9, %s3154_s5 }
  0x48   :  { %p2703_p6 = pnand %p2701_p5, %p2698_p4 }
  0x4a   :  { %2706 = shalt.err (!%p2703_p6)
}
  0x4b   :  { %s2707_s16 = scalar_lea.vmem %s72_s28, 512  ;;  %p2712_p8 = scmp.lt.s32.totalorder %s72_s28, %s72_s28 }
  0x4c   :  { %p2708_p7 = scmp.ne.s32.totalorder %s72_s28, %s2707_s16  ;;  %p2713_p9 = scmp.lt.s32.totalorder %s2707_s16, %s2707_s16 }
  0x4e   :  { %p2714_p10 = por %p2713_p9, %p2712_p8 }
  0x50   :  { %p2715_p11 = pnand %p2714_p10, %p2708_p7 }
  0x52   :  { %2718 = shalt.err (!%p2715_p11)
}
  0x53   :  { %77 = dma.hbm_to_vmem [thread:$0]  %s3154_s5, 512, %s72_s28, [#allocation11], %s2751_s13, %s2751_s13, %s2752_s14  }
  0x54   :  { %2741 = dma.done.wait [#allocation5], 1024  }
  0x55   :  { %2742 = vsyncadd [#allocation5], 4294966272 }
  0x56   :  { %2743 = dma.done.wait [#allocation8], 1024  }
  0x57   :  { %2744 = vsyncadd [#allocation8], 4294966272 }
  0x58   :  { %2745 = dma.done.wait [#allocation11], 1024  }
  0x59   :  { %2746 = vsyncadd [#allocation11], 4294966272  ;;  %v2756_v0 = vmov 0.0|0.0   ;;  %vm2757_vm0 = vmmov 0   ;;  %v2758_v1 = vmov 0.0   ;;  %v95_v2 = vld [vmem:[#allocation7] sm:$0xff] }
  0x5a   :  { %2390 = vmatprep.subr.bf16.mxu0 %v2756_v0  ;;  %2191 = vmatprep.mubr.msk.f32.mxu0 %vm2757_vm0, %v2758_v1  ;;  %v96_v3 = vld [vmem:[#allocation7 + $0x8] sm:$0xff]  ;;  %v97_v4 = vld [vmem:[#allocation7 + $0x10] sm:$0xff]  ;;  %v98_v6 = vld [vmem:[#allocation7 + $0x18] sm:$0xff]  ;;  %s2759_s5 = smov 64   ;;  %s2760_s13 = smov 32   ;;  %vm100_vm1 = vcmask 261120  }
  0x5b   :  { %2396 = vmatprep.subr.bf16.mxu1 %v2756_v0  ;;  %2202 = vmatprep.mubr.msk.f32.mxu1 %vm2757_vm0, %v2758_v1  ;;  %v2897_v5 = vpack.c.bf16 %v96_v3, %v95_v2  ;;  %v2900_v7 = vpack.c.bf16 %v98_v6, %v97_v4  ;;  %v99_v8 = vld [vmem:[#allocation4] sm:$0xff]  ;;  %v206_v27 = vld [vmem:[#allocation4 + $0x8] sm:$0xff]  ;;  %v312_v46 = vld [vmem:[#allocation4 + $0x10] sm:$0xff]  ;;  %s2761_s17 = smov [#allocation13]  }
  0x5c   :  { %v418_v3 = vld [vmem:[#allocation4 + $0x18] sm:$0xff]  ;;  %s2018_s18 = sshll.u32 %s2761_s17, 4  ;;  %s2019_s18 = int_to_ptr.vmem [resolvable:$true] %s2018_s18 }
  0x5d   :  { %2392 = vmatpush3.bf16.msra.mxu0 %v2897_v5  ;;  %2398 = vmatpush3.bf16.msra.mxu1 %v2897_v5  ;;  %s2719_s19 = scalar_lea.vmem %s2019_s18, 128  ;;  %p2724_p13 = scmp.lt.s32.totalorder %s2019_s18, %s2019_s18 }
  0x5e   :  { %2393 = vmatprep.subr.bf16.mxu0 %v2756_v0  ;;  %2399 = vmatprep.subr.bf16.mxu1 %v2756_v0  ;;  %p2720_p12 = scmp.ne.s32.totalorder %s2019_s18, %s2719_s19  ;;  %p2725_p0 = scmp.lt.s32.totalorder %s2719_s19, %s2719_s19 }
  0x60   :  { %p2726_p1 = por %p2725_p0, %p2724_p13 }
  0x61   :  { %2395 = vmatpush3.bf16.msra.mxu0 %v2900_v7  ;;  %2401 = vmatpush3.bf16.msra.mxu1 %v2900_v7 }
  0x62   :  { %2402 = vmatprep.subr.bf16.mxu0 %v2756_v0  ;;  %2408 = vmatprep.subr.bf16.mxu1 %v2756_v0  ;;  %p2727_p2 = pnand %p2726_p1, %p2720_p12 }
  0x64   :  { %2192 = vmatmul.mubr.f32.vlgmr.msra.gmra.mrb[0].mxu0 %v2758_v1 }
  0x65   :  { %2404 = vmatpush3.bf16.msra.mxu0 %v2897_v5  ;;  %2213 = vmatprep.mubr.msk.f32.mxu0 %vm2757_vm0, %v2758_v1 }
  0x66   :  { %2405 = vmatprep.subr.bf16.mxu0 %v2756_v0 }
  0x69   :  { %2407 = vmatpush3.bf16.msra.mxu0 %v2900_v7 }
  0x6a   :  { %2414 = vmatprep.subr.bf16.mxu0 %v2756_v0 }
 0x137   :  { %v170_v9 = vpop.f32.mrb[0].mxu0 }
 0x138   :  { %v174_v10 = vadd.f32 %v170_v9, %v99_v8  ;;  %v2193_v11 = vpop.f32.mrb[1].mxu0 }
 0x13a   :  { %v2029_v12 = vmul.f32 -1.442695, %v174_v10 }
 0x13c   :  { %2513 = vpow2.f32 %v2029_v12 }
 0x146   :  { %v2514_v13 = vpop.eup %2513 }
 0x147   :  { %v178_v14 = vadd.f32 1.0, %v2514_v13 }
 0x149   :  { %2515 = vrcp.f32 %v178_v14 }
 0x153   :  { %v2516_v15 = vpop.eup %2515 }
 0x154   :  { %v181_v16 = vmul.f32 2.0, %v2516_v15  ;;  %v183_v20 = vmul.f32 0.0, %v2516_v15 }
 0x156   :  { %v2030_v17 = vadd.f32 -1.0, %v181_v16 }
 0x158   :  { %185 = vrot.lane.b32.xlu0 %v2030_v17, %s2759_s5 }
 0x1ca   :  { %v186_v18 = vpop.permute.xlu0 %185 }
 0x1cb   :  { %v188_v19 = vmul.f32 %v2516_v15, %v186_v18 }
 0x1cd   :  { %190 = vrot.lane.b32.xlu0 %v188_v19, %s2760_s13 }
 0x23f   :  { %v191_v21 = vpop.permute.xlu0 %190 }
 0x240   :  { %v193_v22 = vadd.f32 %v191_v21, %v183_v20 }
 0x242   :  { %2517 = vtanh.f32 %v193_v22 }
 0x24c   :  { %v2518_v23 = vpop.eup %2517 }
 0x24d   :  { %196 = vrot.lane.b32.xlu1 %v2518_v23, %s2759_s5 }
 0x2bf   :  { %v197_v24 = vpop.permute.xlu1 %196 }
 0x2c0   :  { %v199_v25 = vmul.f32 %v2516_v15, %v197_v24  ;;  %v524_v24 = vld [vmem:[#allocation4 + $0x20] sm:$0xff] }
 0x2c2   :  { %201 = vrot.lane.b32.xlu1 %v199_v25, %s2760_s13 }
 0x334   :  { %v202_v26 = vpop.permute.xlu1 %201 }
 0x335   :  { %204 = vst.msk [vmem:[#allocation2] sm:$0xff] %vm100_vm1, %v202_v26  ;;  %2203 = vmatmul.mubr.msk.f32.vlgmr.msra.gmra.mrb[0].mxu1 %vm100_vm1, %v202_v26 }
 0x336   :  { %2410 = vmatpush3.bf16.msra.mxu1 %v2897_v5  ;;  %2224 = vmatprep.mubr.msk.f32.mxu1 %vm2757_vm0, %v2758_v1 }
 0x337   :  { %2411 = vmatprep.subr.bf16.mxu1 %v2756_v0 }
 0x33a   :  { %2413 = vmatpush3.bf16.msra.mxu1 %v2900_v7 }
 0x33b   :  { %2420 = vmatprep.subr.bf16.mxu1 %v2756_v0 }
 0x408   :  { %v275_v28 = vpop.f32.mrb[0].mxu1 }
 0x409   :  { %v279_v29 = vadd.f32 %v275_v28, %v206_v27  ;;  %v2204_v30 = vpop.f32.mrb[1].mxu1 }
 0x40b   :  { %v2032_v31 = vmul.f32 -1.442695, %v279_v29 }
 0x40d   :  { %2519 = vpow2.f32 %v2032_v31 }
 0x417   :  { %v2520_v32 = vpop.eup %2519 }
 0x418   :  { %v283_v33 = vadd.f32 1.0, %v2520_v32 }
 0x41a   :  { %2521 = vrcp.f32 %v283_v33 }
 0x424   :  { %v2522_v34 = vpop.eup %2521 }
 0x425   :  { %v286_v35 = vmul.f32 2.0, %v2522_v34  ;;  %v288_v39 = vmul.f32 %v2522_v34, %v193_v22 }
 0x427   :  { %v2033_v36 = vadd.f32 -1.0, %v286_v35 }
 0x429   :  { %290 = vrot.lane.b32.xlu0 %v2033_v36, %s2759_s5 }
 0x49b   :  { %v291_v37 = vpop.permute.xlu0 %290 }
 0x49c   :  { %v293_v38 = vmul.f32 %v2522_v34, %v291_v37 }
 0x49e   :  { %295 = vrot.lane.b32.xlu1 %v293_v38, %s2760_s13 }
 0x510   :  { %v296_v40 = vpop.permute.xlu1 %295 }
 0x511   :  { %v298_v41 = vadd.f32 %v296_v40, %v288_v39 }
 0x513   :  { %2523 = vtanh.f32 %v298_v41 }
 0x51d   :  { %v2524_v42 = vpop.eup %2523 }
 0x51e   :  { %301 = vrot.lane.b32.xlu0 %v2524_v42, %s2759_s5 }
 0x590   :  { %v302_v43 = vpop.permute.xlu0 %301 }
 0x591   :  { %v304_v44 = vmul.f32 %v2522_v34, %v302_v43  ;;  %v630_v43 = vld [vmem:[#allocation4 + $0x28] sm:$0xff] }
 0x593   :  { %306 = vrot.lane.b32.xlu1 %v304_v44, %s2760_s13 }
 0x605   :  { %v307_v45 = vpop.permute.xlu1 %306 }
 0x606   :  { %310 = vst.msk [vmem:[#allocation2 + $0x8] sm:$0xff] %vm100_vm1, %v307_v45  ;;  %2214 = vmatmul.mubr.msk.f32.vlgmr.msra.gmra.mrb[2].mxu0 %vm100_vm1, %v307_v45 }
 0x607   :  { %2416 = vmatpush3.bf16.msra.mxu0 %v2897_v5  ;;  %2235 = vmatprep.mubr.msk.f32.mxu0 %vm2757_vm0, %v2758_v1 }
 0x608   :  { %2417 = vmatprep.subr.bf16.mxu0 %v2756_v0 }
 0x60b   :  { %2419 = vmatpush3.bf16.msra.mxu0 %v2900_v7 }
 0x60c   :  { %2426 = vmatprep.subr.bf16.mxu0 %v2756_v0 }
 0x6d9   :  { %v381_v47 = vpop.f32.mrb[2].mxu0 }
 0x6da   :  { %v385_v48 = vadd.f32 %v381_v47, %v312_v46  ;;  %v2215_v49 = vpop.f32.mrb[3].mxu0 }
 0x6dc   :  { %v2035_v50 = vmul.f32 -1.442695, %v385_v48 }
 0x6de   :  { %2525 = vpow2.f32 %v2035_v50 }
 0x6e8   :  { %v2526_v51 = vpop.eup %2525 }
 0x6e9   :  { %v389_v52 = vadd.f32 1.0, %v2526_v51 }
 0x6eb   :  { %2527 = vrcp.f32 %v389_v52 }
 0x6f5   :  { %v2528_v53 = vpop.eup %2527 }
 0x6f6   :  { %v392_v54 = vmul.f32 2.0, %v2528_v53  ;;  %v394_v58 = vmul.f32 %v2528_v53, %v298_v41 }
 0x6f8   :  { %v2036_v55 = vadd.f32 -1.0, %v392_v54 }
 0x6fa   :  { %396 = vrot.lane.b32.xlu0 %v2036_v55, %s2759_s5 }
 0x76c   :  { %v397_v56 = vpop.permute.xlu0 %396 }
 0x76d   :  { %v399_v57 = vmul.f32 %v2528_v53, %v397_v56  ;;  %v955_v56 = vld [vmem:[#allocation9] sm:$0xff] }
 0x76f   :  { %401 = vrot.lane.b32.xlu1 %v399_v57, %s2760_s13  ;;  %v956_v57 = vld [vmem:[#allocation9 + $0x8] sm:$0xff] }
 0x7e1   :  { %v402_v59 = vpop.permute.xlu1 %401 }
 0x7e2   :  { %v404_v60 = vadd.f32 %v402_v59, %v394_v58  ;;  %v2438_v58 = vpack.c.bf16 %v956_v57, %v955_v56  ;;  %v842_v57 = vld [vmem:[#allocation4 + $0x38] sm:$0xff] }
 0x7e4   :  { %2529 = vtanh.f32 %v404_v60 }
 0x7ee   :  { %v2530_v61 = vpop.eup %2529 }
 0x7ef   :  { %407 = vrot.lane.b32.xlu0 %v2530_v61, %s2759_s5 }
 0x861   :  { %v408_v62 = vpop.permute.xlu0 %407 }
 0x862   :  { %v410_v63 = vmul.f32 %v2528_v53, %v408_v62  ;;  %v957_v62 = vld [vmem:[#allocation9 + $0x10] sm:$0xff] }
 0x864   :  { %412 = vrot.lane.b32.xlu1 %v410_v63, %s2760_s13  ;;  %v958_v63 = vld [vmem:[#allocation9 + $0x18] sm:$0xff] }
 0x8d6   :  { %v413_v2 = vpop.permute.xlu1 %412 }
 0x8d7   :  { %416 = vst.msk [vmem:[#allocation2 + $0x10] sm:$0xff] %vm100_vm1, %v413_v2  ;;  %2225 = vmatmul.mubr.msk.f32.vlgmr.msra.gmra.mrb[2].mxu1 %vm100_vm1, %v413_v2  ;;  %v2442_v2 = vpack.c.bf16 %v958_v63, %v957_v62 }
 0x8d8   :  { %2422 = vmatpush3.bf16.msra.mxu1 %v2897_v5  ;;  %2246 = vmatprep.mubr.msk.f32.mxu1 %vm2757_vm0, %v2758_v1 }
 0x8d9   :  { %2423 = vmatprep.subr.bf16.mxu1 %v2756_v0 }
 0x8dc   :  { %2425 = vmatpush3.bf16.msra.mxu1 %v2900_v7 }
 0x8dd   :  { %2432 = vmatprep.subr.bf16.mxu1 %v2756_v0 }
 0x9aa   :  { %v487_v4 = vpop.f32.mrb[2].mxu1 }
 0x9ab   :  { %v491_v6 = vadd.f32 %v487_v4, %v418_v3  ;;  %v2226_v8 = vpop.f32.mrb[3].mxu1  ;;  %v947_v4 = vld [vmem:[#allocation2] sm:$0xff] }
 0x9ac   :  { %v949_v8 = vld [vmem:[#allocation2 + $0x10] sm:$0xff] }
 0x9ad   :  { %v2038_v9 = vmul.f32 -1.442695, %v491_v6  ;;  %v948_v6 = vld [vmem:[#allocation2 + $0x8] sm:$0xff] }
 0x9af   :  { %2531 = vpow2.f32 %v2038_v9 }
 0x9b9   :  { %v2532_v10 = vpop.eup %2531 }
 0x9ba   :  { %v495_v11 = vadd.f32 1.0, %v2532_v10 }
 0x9bc   :  { %2533 = vrcp.f32 %v495_v11 }
 0x9c6   :  { %v2534_v12 = vpop.eup %2533 }
 0x9c7   :  { %v498_v13 = vmul.f32 2.0, %v2534_v12  ;;  %v500_v17 = vmul.f32 %v2534_v12, %v404_v60 }
 0x9c9   :  { %v2039_v14 = vadd.f32 -1.0, %v498_v13 }
 0x9cb   :  { %502 = vrot.lane.b32.xlu0 %v2039_v14, %s2759_s5 }
 0xa3d   :  { %v503_v15 = vpop.permute.xlu0 %502 }
 0xa3e   :  { %v505_v16 = vmul.f32 %v2534_v12, %v503_v15 }
 0xa40   :  { %507 = vrot.lane.b32.xlu1 %v505_v16, %s2760_s13 }
 0xab2   :  { %v508_v18 = vpop.permute.xlu1 %507 }
 0xab3   :  { %v510_v19 = vadd.f32 %v508_v18, %v500_v17 }
 0xab5   :  { %2535 = vtanh.f32 %v510_v19 }
 0xabf   :  { %v2536_v20 = vpop.eup %2535 }
 0xac0   :  { %513 = vrot.lane.b32.xlu0 %v2536_v20, %s2759_s5 }
 0xb32   :  { %v514_v21 = vpop.permute.xlu0 %513 }
 0xb33   :  { %v516_v22 = vmul.f32 %v2534_v12, %v514_v21  ;;  %v736_v12 = vld [vmem:[#allocation4 + $0x30] sm:$0xff] }
 0xb35   :  { %518 = vrot.lane.b32.xlu1 %v516_v22, %s2760_s13 }
 0xba7   :  { %v519_v23 = vpop.permute.xlu1 %518 }
 0xba8   :  { %522 = vst.msk [vmem:[#allocation2 + $0x18] sm:$0xff] %vm100_vm1, %v519_v23  ;;  %2236 = vmatmul.mubr.msk.f32.vlgmr.msra.gmra.mrb[4].mxu0 %vm100_vm1, %v519_v23 }
 0xba9   :  { %2428 = vmatpush3.bf16.msra.mxu0 %v2897_v5  ;;  %2257 = vmatprep.mubr.msk.f32.mxu0 %vm2757_vm0, %v2758_v1 }
 0xbaa   :  { %2429 = vmatprep.subr.bf16.mxu0 %v2756_v0 }
 0xbad   :  { %2431 = vmatpush3.bf16.msra.mxu0 %v2900_v7 }
 0xbae   :  { %2439 = vmatprep.subr.bf16.mxu0 %v2438_v58 }
 0xbaf   :  { %v950_v9 = vld [vmem:[#allocation2 + $0x18] sm:$0xff] }
 0xc7b   :  { %v593_v25 = vpop.f32.mrb[4].mxu0 }
 0xc7c   :  { %v597_v26 = vadd.f32 %v593_v25, %v524_v24  ;;  %v2237_v27 = vpop.f32.mrb[5].mxu0 }
 0xc7e   :  { %v2041_v28 = vmul.f32 -1.442695, %v597_v26 }
 0xc80   :  { %2537 = vpow2.f32 %v2041_v28 }
 0xc8a   :  { %v2538_v29 = vpop.eup %2537 }
 0xc8b   :  { %v601_v30 = vadd.f32 1.0, %v2538_v29 }
 0xc8d   :  { %2539 = vrcp.f32 %v601_v30 }
 0xc97   :  { %v2540_v31 = vpop.eup %2539 }
 0xc98   :  { %v604_v32 = vmul.f32 2.0, %v2540_v31  ;;  %v606_v36 = vmul.f32 %v2540_v31, %v510_v19 }
 0xc9a   :  { %v2042_v33 = vadd.f32 -1.0, %v604_v32 }
 0xc9c   :  { %608 = vrot.lane.b32.xlu0 %v2042_v33, %s2759_s5 }
 0xd0e   :  { %v609_v34 = vpop.permute.xlu0 %608 }
 0xd0f   :  { %v611_v35 = vmul.f32 %v2540_v31, %v609_v34  ;;  %v1103_v34 = vld [vmem:[#allocation10] sm:$0xff] }
 0xd11   :  { %613 = vrot.lane.b32.xlu1 %v611_v35, %s2760_s13  ;;  %v1104_v35 = vld [vmem:[#allocation10 + $0x8] sm:$0xff] }
 0xd83   :  { %v614_v37 = vpop.permute.xlu1 %613 }
 0xd84   :  { %v616_v38 = vadd.f32 %v614_v37, %v606_v36  ;;  %v3004_v36 = vpack.c.bf16 %v1104_v35, %v1103_v34  ;;  %v1105_v37 = vld [vmem:[#allocation10 + $0x10] sm:$0xff] }
 0xd86   :  { %2541 = vtanh.f32 %v616_v38 }
 0xd90   :  { %v2542_v39 = vpop.eup %2541 }
 0xd91   :  { %619 = vrot.lane.b32.xlu0 %v2542_v39, %s2759_s5 }
 0xe03   :  { %v620_v40 = vpop.permute.xlu0 %619 }
 0xe04   :  { %v622_v41 = vmul.f32 %v2540_v31, %v620_v40 }
 0xe06   :  { %624 = vrot.lane.b32.xlu1 %v622_v41, %s2760_s13 }
 0xe78   :  { %v625_v42 = vpop.permute.xlu1 %624 }
 0xe79   :  { %628 = vst.msk [vmem:[#allocation2 + $0x20] sm:$0xff] %vm100_vm1, %v625_v42  ;;  %2247 = vmatmul.mubr.msk.f32.vlgmr.msra.gmra.mrb[4].mxu1 %vm100_vm1, %v625_v42 }
 0xe7a   :  { %2434 = vmatpush3.bf16.msra.mxu1 %v2897_v5  ;;  %2268 = vmatprep.mubr.msk.f32.mxu1 %vm2757_vm0, %v2758_v1 }
 0xe7b   :  { %2435 = vmatprep.subr.bf16.mxu1 %v2756_v0 }
 0xe7e   :  { %2437 = vmatpush3.bf16.msra.mxu1 %v2900_v7 }
 0xe7f   :  { %2446 = vmatprep.subr.bf16.mxu1 %v2756_v0 }
 0xe80   :  { %v951_v10 = vld [vmem:[#allocation2 + $0x20] sm:$0xff] }
 0xf4c   :  { %v699_v44 = vpop.f32.mrb[4].mxu1 }
 0xf4d   :  { %v703_v45 = vadd.f32 %v699_v44, %v630_v43  ;;  %v2248_v46 = vpop.f32.mrb[5].mxu1 }
 0xf4e   :  { %v3032_v46 = vld [vmem:[%s3153_s4] ss:$0 sm:$0xff] }
 0xf4f   :  { %v2044_v47 = vmul.f32 -1.442695, %v703_v45 }
 0xf51   :  { %2543 = vpow2.f32 %v2044_v47 }
 0xf5b   :  { %v2544_v48 = vpop.eup %2543 }
 0xf5c   :  { %v707_v49 = vadd.f32 1.0, %v2544_v48 }
 0xf5e   :  { %2545 = vrcp.f32 %v707_v49 }
 0xf68   :  { %v2546_v50 = vpop.eup %2545 }
 0xf69   :  { %v710_v5 = vmul.f32 2.0, %v2546_v50  ;;  %v712_v7 = vmul.f32 %v2546_v50, %v616_v38  ;;  %v1106_v38 = vld [vmem:[#allocation10 + $0x18] sm:$0xff] }
 0xf6a   :  { %v3008_v39 = vpack.c.bf16 %v1106_v38, %v1105_v37 }
 0xf6b   :  { %v2045_v51 = vadd.f32 -1.0, %v710_v5 }
 0xf6d   :  { %714 = vrot.lane.b32.xlu0 %v2045_v51, %s2759_s5 }
 0xfdf   :  { %v715_v52 = vpop.permute.xlu0 %714 }
 0xfe0   :  { %v717_v53 = vmul.f32 %v2546_v50, %v715_v52 }
 0xfe2   :  { %719 = vrot.lane.b32.xlu1 %v717_v53, %s2760_s13 }
0x1054   :  { %v720_v54 = vpop.permute.xlu1 %719 }
0x1055   :  { %v722_v55 = vadd.f32 %v720_v54, %v712_v7 }
0x1057   :  { %2547 = vtanh.f32 %v722_v55 }
0x1061   :  { %v2548_v59 = vpop.eup %2547 }
0x1062   :  { %725 = vrot.lane.b32.xlu0 %v2548_v59, %s2759_s5 }
0x10d4   :  { %v726_v60 = vpop.permute.xlu0 %725 }
0x10d5   :  { %v728_v61 = vmul.f32 %v2546_v50, %v726_v60 }
0x10d7   :  { %730 = vrot.lane.b32.xlu1 %v728_v61, %s2760_s13 }
0x1149   :  { %v731_v3 = vpop.permute.xlu1 %730 }
0x114a   :  { %734 = vst.msk [vmem:[#allocation2 + $0x28] sm:$0xff] %vm100_vm1, %v731_v3  ;;  %2258 = vmatmul.mubr.msk.f32.vlgmr.msra.gmra.mrb[6].mxu0 %vm100_vm1, %v731_v3 }
0x114b   :  { %2441 = vmatpush3.bf16.msra.mxu0 %v2438_v58  ;;  %2279 = vmatprep.mubr.msk.f32.mxu0 %vm100_vm1, %v947_v4 }
0x114c   :  { %2443 = vmatprep.subr.bf16.mxu0 %v2442_v2 }
0x114f   :  { %2445 = vmatpush3.bf16.msra.mxu0 %v2442_v2 }
0x1150   :  { %2458 = vmatprep.subr.bf16.mxu0 %v2756_v0 }
0x1151   :  { %v952_v11 = vld [vmem:[#allocation2 + $0x28] sm:$0xff] }
0x1152   :  { %2280 = vmatmul.mubr.msk.f32.vlgmr.msra.gmra.mrb[8].mxu0 %vm100_vm1, %v948_v6 }
0x1153   :  { %2282 = vmatprep.mubr.msk.f32.mxu0 %vm100_vm1, %v949_v8  ;;  %2460 = vmatpush3.bf16.msra.mxu0 %v3004_v36 }
0x1154   :  { %2461 = vmatprep.subr.bf16.mxu0 %v2756_v0 }
0x1156   :  { %2283 = vmatmul.mubr.msk.f32.gmra.mrb[10].mxu0 %vm100_vm1, %v950_v9 }
0x1157   :  { %2285 = vmatprep.mubr.msk.f32.mxu0 %vm100_vm1, %v951_v10  ;;  %2463 = vmatpush3.bf16.msra.mxu0 %v3008_v39 }
0x1158   :  { %2470 = vmatprep.subr.bf16.mxu0 %v2756_v0 }
0x115a   :  { %2286 = vmatmul.mubr.msk.f32.gmra.mrb[12].mxu0 %vm100_vm1, %v952_v11 }
0x121d   :  { %v805_v13 = vpop.f32.mrb[6].mxu0 }
0x121e   :  { %v809_v14 = vadd.f32 %v805_v13, %v736_v12  ;;  %v2259_v15 = vpop.f32.mrb[7].mxu0 }
0x1220   :  { %v2047_v16 = vmul.f32 -1.442695, %v809_v14 }
0x1222   :  { %2549 = vpow2.f32 %v2047_v16 }
0x1225   :  { %v2988_v17 = vpop.f32.mrb[8].mxu0 }
0x1226   :  { %v1056_v18 = vpop.f32.mrb[9].mxu0 }
0x1227   :  { %v1057_v47 = vadd.f32 %v3032_v46, %v1056_v18 }
0x1229   :  { %v2990_v19 = vpop.f32.mrb[10].mxu0 }
0x122a   :  { %v2992_v20 = vpop.f32.mrb[11].mxu0 }
0x122c   :  { %v2550_v21 = vpop.eup %2549 }
0x122d   :  { %v813_v22 = vadd.f32 1.0, %v2550_v21  ;;  %v2994_v23 = vpop.f32.mrb[12].mxu0 }
0x122e   :  { %v2996_v24 = vpop.f32.mrb[13].mxu0 }
0x122f   :  { %2551 = vrcp.f32 %v813_v22 }
0x1239   :  { %v2552_v25 = vpop.eup %2551 }
0x123a   :  { %v816_v26 = vmul.f32 2.0, %v2552_v25  ;;  %v818_v30 = vmul.f32 %v2552_v25, %v722_v55 }
0x123c   :  { %v2048_v27 = vadd.f32 -1.0, %v816_v26 }
0x123e   :  { %820 = vrot.lane.b32.xlu0 %v2048_v27, %s2759_s5 }
0x12b0   :  { %v821_v28 = vpop.permute.xlu0 %820 }
0x12b1   :  { %v823_v29 = vmul.f32 %v2552_v25, %v821_v28 }
0x12b3   :  { %825 = vrot.lane.b32.xlu1 %v823_v29, %s2760_s13 }
0x1325   :  { %v826_v31 = vpop.permute.xlu1 %825 }
0x1326   :  { %v3000_v32 = vadd.f32 %v826_v31, %v818_v30 }
0x1328   :  { %2553 = vtanh.f32 %v3000_v32 }
0x1332   :  { %v2554_v33 = vpop.eup %2553 }
0x1333   :  { %831 = vrot.lane.b32.xlu0 %v2554_v33, %s2759_s5 }
0x13a5   :  { %v832_v40 = vpop.permute.xlu0 %831 }
0x13a6   :  { %v834_v41 = vmul.f32 %v2552_v25, %v832_v40  ;;  %v1062_v25 = vadd.f32 %v2988_v17, %v3032_v46 }
0x13a8   :  { %836 = vrot.lane.b32.xlu1 %v834_v41, %s2760_s13 }
0x141a   :  { %v837_v42 = vpop.permute.xlu1 %836 }
0x141b   :  { %840 = vst.msk [vmem:[#allocation2 + $0x30] sm:$0xff] %vm100_vm1, %v837_v42  ;;  %2269 = vmatmul.mubr.msk.f32.vlgmr.msra.gmra.mrb[6].mxu1 %vm100_vm1, %v837_v42 }
0x141c   :  { %2448 = vmatpush3.bf16.msra.mxu1 %v3004_v36  ;;  %2299 = vmatprep.mubr.msk.f32.mxu1 %vm2757_vm0, %v2758_v1 }
0x141d   :  { %2449 = vmatprep.subr.bf16.mxu1 %v2756_v0 }
0x1420   :  { %2451 = vmatpush3.bf16.msra.mxu1 %v3008_v39 }
0x1421   :  { %2452 = vmatprep.subr.bf16.mxu1 %v2756_v0 }
0x1422   :  { %v953_v43 = vld [vmem:[#allocation2 + $0x30] sm:$0xff] }
0x1423   :  { %2300 = vmatmul.mubr.f32.vlgmr.msra.gmra.mrb[8].mxu1 %v2758_v1  ;;  %2288 = vmatprep.mubr.msk.f32.mxu0 %vm100_vm1, %v953_v43 }
0x1424   :  { %2454 = vmatpush3.bf16.msra.mxu1 %v3004_v36  ;;  %2310 = vmatprep.mubr.msk.f32.mxu1 %vm2757_vm0, %v2758_v1 }
0x1425   :  { %2455 = vmatprep.subr.bf16.mxu1 %v2756_v0 }
0x1428   :  { %2457 = vmatpush3.bf16.msra.mxu1 %v3008_v39 }
0x1429   :  { %2464 = vmatprep.subr.bf16.mxu1 %v2756_v0 }
0x14ee   :  { %v911_v44 = vpop.f32.mrb[6].mxu1 }
0x14ef   :  { %v2270_v45 = vpop.f32.mrb[7].mxu1  ;;  %v915_v58 = vadd.f32 %v911_v44, %v842_v57 }
0x14f1   :  { %v2050_v59 = vmul.f32 -1.442695, %v915_v58 }
0x14f6   :  { %v1174_v48 = vpop.f32.mrb[8].mxu1 }
0x14f7   :  { %v1178_v49 = vadd.f32 %v1174_v48, %v1057_v47  ;;  %v2301_v50 = vpop.f32.mrb[9].mxu1 }
0x14f8   :  { %v1067_v50 = vadd.f32 %v3032_v46, %v2992_v20 }
0x14f9   :  { %v2061_v5 = vmul.f32 -1.442695, %v1178_v49 }
0x14fb   :  { %2555 = vpow2.f32 %v2061_v5 }
0x1505   :  { %v2556_v51 = vpop.eup %2555 }
0x1506   :  { %v1182_v52 = vadd.f32 1.0, %v2556_v51 }
0x1508   :  { %2557 = vrcp.f32 %v1182_v52 }
0x1509   :  { %2559 = vpow2.f32 %v2050_v59 }
0x1512   :  { %v2558_v53 = vpop.eup %2557 }
0x1513   :  { %v1185_v7 = vmul.f32 2.0, %v2558_v53  ;;  %v2560_v60 = vpop.eup %2559  ;;  %v1187_v62 = vmul.f32 0.0, %v2558_v53 }
0x1514   :  { %v919_v61 = vadd.f32 1.0, %v2560_v60 }
0x1515   :  { %v2062_v54 = vadd.f32 -1.0, %v1185_v7 }
0x1516   :  { %2561 = vrcp.f32 %v919_v61 }
0x1517   :  { %1189 = vrot.lane.b32.xlu0 %v2062_v54, %s2759_s5 }
0x1520   :  { %v2562_v3 = vpop.eup %2561 }
0x1521   :  { %v922_v4 = vmul.f32 2.0, %v2562_v3  ;;  %v924_v14 = vmul.f32 %v2562_v3, %v3000_v32 }
0x1523   :  { %v2051_v8 = vadd.f32 -1.0, %v922_v4  ;;  %v1072_v4 = vadd.f32 %v2990_v19, %v3032_v46 }
0x1589   :  { %v1190_v55 = vpop.permute.xlu0 %1189 }
0x158a   :  { %v1192_v56 = vmul.f32 %v2558_v53, %v1190_v55 }
0x158c   :  { %1194 = vrot.lane.b32.xlu1 %v1192_v56, %s2760_s13 }
0x15fe   :  { %v1195_v63 = vpop.permute.xlu1 %1194 }
0x15ff   :  { %v1197_v2 = vadd.f32 %v1195_v63, %v1187_v62 }
0x1601   :  { %2563 = vtanh.f32 %v1197_v2 }
0x160b   :  { %v2564_v6 = vpop.eup %2563 }
0x160c   :  { %1200 = vrot.lane.b32.xlu0 %v2564_v6, %s2759_s5 }
0x1610   :  { %926 = vrot.lane.b32.xlu0 %v2051_v8, %s2759_s5 }
0x167e   :  { %v1201_v9 = vpop.permute.xlu0 %1200 }
0x167f   :  { %v1203_v10 = vmul.f32 %v2558_v53, %v1201_v9 }
0x1681   :  { %1207 = vrot.lane.b32.xlu1 %v1203_v10, %s2760_s13 }
0x1682   :  { %v927_v11 = vpop.permute.xlu0 %926 }
0x1683   :  { %v929_v12 = vmul.f32 %v2562_v3, %v927_v11 }
0x1685   :  { %931 = vrot.lane.b32.xlu0 %v929_v12, %s2760_s13 }
0x16f3   :  { %v1208_v13 = vpop.permute.xlu1 %1207 }
0x16f4   :  { %2311 = vmatmul.mubr.msk.f32.vlgmr.msra.gmra.mrb[10].mxu1 %vm100_vm1, %v1208_v13 }
0x16f5   :  { %2466 = vmatpush3.bf16.msra.mxu1 %v3004_v36  ;;  %2332 = vmatprep.mubr.msk.f32.mxu1 %vm2757_vm0, %v2758_v1 }
0x16f6   :  { %2467 = vmatprep.subr.bf16.mxu1 %v2756_v0 }
0x16f7   :  { %v932_v15 = vpop.permute.xlu0 %931 }
0x16f8   :  { %v934_v16 = vadd.f32 %v932_v15, %v924_v14 }
0x16f9   :  { %2469 = vmatpush3.bf16.msra.mxu1 %v3008_v39 }
0x16fa   :  { %2565 = vtanh.f32 %v934_v16  ;;  %2476 = vmatprep.subr.bf16.mxu1 %v2756_v0 }
0x1704   :  { %v2566_v18 = vpop.eup %2565 }
0x1705   :  { %937 = vrot.lane.b32.xlu0 %v2566_v18, %s2759_s5 }
0x1777   :  { %v938_v21 = vpop.permute.xlu0 %937 }
0x1778   :  { %v940_v22 = vmul.f32 %v2562_v3, %v938_v21 }
0x177a   :  { %942 = vrot.lane.b32.xlu0 %v940_v22, %s2760_s13 }
0x17c7   :  { %v1277_v26 = vpop.f32.mrb[10].mxu1 }
0x17c8   :  { %v1281_v27 = vadd.f32 %v1277_v26, %v1062_v25  ;;  %v2312_v28 = vpop.f32.mrb[11].mxu1 }
0x17ca   :  { %v2064_v29 = vmul.f32 -1.442695, %v1281_v27 }
0x17cc   :  { %2567 = vpow2.f32 %v2064_v29  ;;  %v1077_v29 = vadd.f32 %v3032_v46, %v2996_v24 }
0x17d6   :  { %v2568_v30 = vpop.eup %2567 }
0x17d7   :  { %v1285_v31 = vadd.f32 1.0, %v2568_v30 }
0x17d9   :  { %2569 = vrcp.f32 %v1285_v31 }
0x17e3   :  { %v2570_v32 = vpop.eup %2569 }
0x17e4   :  { %v1288_v33 = vmul.f32 2.0, %v2570_v32  ;;  %v1290_v42 = vmul.f32 %v2570_v32, %v1197_v2 }
0x17e6   :  { %v2065_v34 = vadd.f32 -1.0, %v1288_v33 }
0x17e8   :  { %1292 = vrot.lane.b32.xlu1 %v2065_v34, %s2759_s5 }
0x17ec   :  { %v943_v35 = vpop.permute.xlu0 %942 }
0x17ed   :  { %946 = vst.msk [vmem:[#allocation2 + $0x38] sm:$0xff] %vm100_vm1, %v943_v35 }
0x17f4   :  { %v954_v37 = vld [vmem:[#allocation2 + $0x38] sm:$0xff] }
0x17f5   :  { %2289 = vmatmul.mubr.msk.f32.gmra.mrb[14].mxu0 %vm100_vm1, %v954_v37 }
0x17f6   :  { %2321 = vmatprep.mubr.msk.f32.mxu0 %vm2757_vm0, %v2758_v1 }
0x185a   :  { %v1293_v17 = vpop.permute.xlu1 %1292 }
0x185b   :  { %v1295_v38 = vmul.f32 %v2570_v32, %v1293_v17 }
0x185d   :  { %1297 = vrot.lane.b32.xlu1 %v1295_v38, %s2760_s13 }
0x18c8   :  { %v3059_v40 = vpop.f32.mrb[14].mxu0 }
0x18c9   :  { %v3061_v41 = vpop.f32.mrb[15].mxu0 }
0x18cf   :  { %v1298_v43 = vpop.permute.xlu1 %1297 }
0x18d0   :  { %v1300_v44 = vadd.f32 %v1298_v43, %v1290_v42 }
0x18d2   :  { %2571 = vtanh.f32 %v1300_v44 }
0x18dc   :  { %v2572_v45 = vpop.eup %2571 }
0x18dd   :  { %1303 = vrot.lane.b32.xlu1 %v2572_v45, %s2759_s5 }
0x194f   :  { %v1304_v47 = vpop.permute.xlu1 %1303 }
0x1950   :  { %v1306_v48 = vmul.f32 %v2570_v32, %v1304_v47 }
0x1952   :  { %1310 = vrot.lane.b32.xlu1 %v1306_v48, %s2760_s13 }
0x19c4   :  { %v1311_v49 = vpop.permute.xlu1 %1310 }
0x19c5   :  { %2322 = vmatmul.mubr.msk.f32.vlgmr.msra.gmra.mrb[16].mxu0 %vm100_vm1, %v1311_v49 }
0x19c6   :  { %2472 = vmatpush3.bf16.msra.mxu0 %v3004_v36  ;;  %2343 = vmatprep.mubr.msk.f32.mxu0 %vm2757_vm0, %v2758_v1 }
0x19c7   :  { %2473 = vmatprep.subr.bf16.mxu0 %v2756_v0 }
0x19ca   :  { %2475 = vmatpush3.bf16.msra.mxu0 %v3008_v39 }
0x19cb   :  { %2482 = vmatprep.subr.bf16.mxu0 %v2756_v0 }
0x1a98   :  { %v1380_v5 = vpop.f32.mrb[16].mxu0 }
0x1a99   :  { %v1384_v51 = vadd.f32 %v1380_v5, %v1067_v50  ;;  %v2323_v52 = vpop.f32.mrb[17].mxu0  ;;  %v1082_v5 = vadd.f32 %v2994_v23, %v3032_v46 }
0x1a9b   :  { %v2067_v53 = vmul.f32 -1.442695, %v1384_v51 }
0x1a9d   :  { %2573 = vpow2.f32 %v2067_v53 }
0x1aa7   :  { %v2574_v7 = vpop.eup %2573 }
0x1aa8   :  { %v1388_v54 = vadd.f32 1.0, %v2574_v7 }
0x1aaa   :  { %2575 = vrcp.f32 %v1388_v54 }
0x1ab4   :  { %v2576_v55 = vpop.eup %2575 }
0x1ab5   :  { %v1391_v56 = vmul.f32 2.0, %v2576_v55  ;;  %v1393_v60 = vmul.f32 %v2576_v55, %v1300_v44 }
0x1ab7   :  { %v2068_v57 = vadd.f32 -1.0, %v1391_v56 }
0x1ab9   :  { %1395 = vrot.lane.b32.xlu0 %v2068_v57, %s2759_s5 }
0x1b2b   :  { %v1396_v58 = vpop.permute.xlu0 %1395 }
0x1b2c   :  { %v1398_v59 = vmul.f32 %v2576_v55, %v1396_v58 }
0x1b2e   :  { %1400 = vrot.lane.b32.xlu1 %v1398_v59, %s2760_s13 }
0x1ba0   :  { %v1401_v61 = vpop.permute.xlu1 %1400 }
0x1ba1   :  { %v1403_v20 = vadd.f32 %v1401_v61, %v1393_v60 }
0x1ba3   :  { %2577 = vtanh.f32 %v1403_v20 }
0x1bad   :  { %v2578_v62 = vpop.eup %2577 }
0x1bae   :  { %1406 = vrot.lane.b32.xlu0 %v2578_v62, %s2759_s5 }
0x1c20   :  { %v1407_v63 = vpop.permute.xlu0 %1406 }
0x1c21   :  { %v1409_v2 = vmul.f32 %v2576_v55, %v1407_v63 }
0x1c23   :  { %1413 = vrot.lane.b32.xlu1 %v1409_v2, %s2760_s13  ;;  %v1087_v2 = vadd.f32 %v3032_v46, %v3061_v41 }
0x1c95   :  { %v1414_v3 = vpop.permute.xlu1 %1413 }
0x1c96   :  { %2333 = vmatmul.mubr.msk.f32.vlgmr.msra.gmra.mrb[12].mxu1 %vm100_vm1, %v1414_v3 }
0x1c97   :  { %2478 = vmatpush3.bf16.msra.mxu1 %v3004_v36  ;;  %2354 = vmatprep.mubr.msk.f32.mxu1 %vm2757_vm0, %v2758_v1 }
0x1c98   :  { %2479 = vmatprep.subr.bf16.mxu1 %v2756_v0 }
0x1c9b   :  { %2481 = vmatpush3.bf16.msra.mxu1 %v3008_v39 }
0x1c9c   :  { %2488 = vmatprep.subr.bf16.mxu1 %v2756_v0 }
0x1d69   :  { %v1483_v6 = vpop.f32.mrb[12].mxu1 }
0x1d6a   :  { %v1487_v8 = vadd.f32 %v1483_v6, %v1072_v4  ;;  %v2334_v9 = vpop.f32.mrb[13].mxu1 }
0x1d6c   :  { %v2070_v10 = vmul.f32 -1.442695, %v1487_v8 }
0x1d6e   :  { %2579 = vpow2.f32 %v2070_v10 }
0x1d78   :  { %v2580_v11 = vpop.eup %2579 }
0x1d79   :  { %v1491_v12 = vadd.f32 1.0, %v2580_v11 }
0x1d7b   :  { %2581 = vrcp.f32 %v1491_v12 }
0x1d85   :  { %v2582_v13 = vpop.eup %2581 }
0x1d86   :  { %v1494_v14 = vmul.f32 2.0, %v2582_v13  ;;  %v1496_v21 = vmul.f32 %v2582_v13, %v1403_v20 }
0x1d88   :  { %v2071_v15 = vadd.f32 -1.0, %v1494_v14 }
0x1d8a   :  { %1498 = vrot.lane.b32.xlu0 %v2071_v15, %s2759_s5 }
0x1dfc   :  { %v1499_v16 = vpop.permute.xlu0 %1498 }
0x1dfd   :  { %v1501_v18 = vmul.f32 %v2582_v13, %v1499_v16 }
0x1dff   :  { %1503 = vrot.lane.b32.xlu1 %v1501_v18, %s2760_s13 }
0x1e71   :  { %v1504_v22 = vpop.permute.xlu1 %1503 }
0x1e72   :  { %v1506_v19 = vadd.f32 %v1504_v22, %v1496_v21 }
0x1e74   :  { %2583 = vtanh.f32 %v1506_v19 }
0x1e7e   :  { %v2584_v25 = vpop.eup %2583 }
0x1e7f   :  { %1509 = vrot.lane.b32.xlu0 %v2584_v25, %s2759_s5  ;;  %v1092_v25 = vadd.f32 %v3059_v40, %v3032_v46  ;;  %v1925_v40 = vld [vmem:[#allocation12] sm:$0xff] }
0x1ef1   :  { %v1510_v26 = vpop.permute.xlu0 %1509 }
0x1ef2   :  { %v1512_v27 = vmul.f32 %v2582_v13, %v1510_v26 }
0x1ef4   :  { %1516 = vrot.lane.b32.xlu1 %v1512_v27, %s2760_s13 }
0x1f66   :  { %v1517_v28 = vpop.permute.xlu1 %1516 }
0x1f67   :  { %2344 = vmatmul.mubr.msk.f32.vlgmr.msra.gmra.mrb[18].mxu0 %vm100_vm1, %v1517_v28 }
0x1f68   :  { %2484 = vmatpush3.bf16.msra.mxu0 %v3004_v36  ;;  %2365 = vmatprep.mubr.msk.f32.mxu0 %vm2757_vm0, %v2758_v1 }
0x1f69   :  { %2485 = vmatprep.subr.bf16.mxu0 %v2756_v0 }
0x1f6c   :  { %2487 = vmatpush3.bf16.msra.mxu0 %v3008_v39 }
0x1f6d   :  { %2494 = vmatprep.subr.bf16.mxu0 %v2756_v0 }
0x203a   :  { %v1586_v30 = vpop.f32.mrb[18].mxu0 }
0x203b   :  { %v1590_v31 = vadd.f32 %v1586_v30, %v1077_v29  ;;  %v2345_v32 = vpop.f32.mrb[19].mxu0 }
0x203d   :  { %v2073_v33 = vmul.f32 -1.442695, %v1590_v31 }
0x203f   :  { %2585 = vpow2.f32 %v2073_v33 }
0x2049   :  { %v2586_v34 = vpop.eup %2585 }
0x204a   :  { %v1594_v35 = vadd.f32 1.0, %v2586_v34 }
0x204c   :  { %2587 = vrcp.f32 %v1594_v35 }
0x2056   :  { %v2588_v37 = vpop.eup %2587 }
0x2057   :  { %v1597_v17 = vmul.f32 2.0, %v2588_v37  ;;  %v1599_v44 = vmul.f32 %v2588_v37, %v1506_v19 }
0x2059   :  { %v2074_v38 = vadd.f32 -1.0, %v1597_v17 }
0x205b   :  { %1601 = vrot.lane.b32.xlu0 %v2074_v38, %s2759_s5 }
0x20cd   :  { %v1602_v42 = vpop.permute.xlu0 %1601 }
0x20ce   :  { %v1604_v43 = vmul.f32 %v2588_v37, %v1602_v42  ;;  %v1926_v42 = vld [vmem:[#allocation12 + $0x8] sm:$0xff] }
0x20d0   :  { %1606 = vrot.lane.b32.xlu1 %v1604_v43, %s2760_s13  ;;  %v1927_v43 = vld [vmem:[#allocation12 + $0x10] sm:$0xff] }
0x2142   :  { %v1607_v45 = vpop.permute.xlu1 %1606 }
0x2143   :  { %v1609_v24 = vadd.f32 %v1607_v45, %v1599_v44  ;;  %v2495_v44 = vpack.c.bf16 %v1926_v42, %v1925_v40  ;;  %v1928_v45 = vld [vmem:[#allocation12 + $0x18] sm:$0xff] }
0x2145   :  { %2589 = vtanh.f32 %v1609_v24 }
0x214f   :  { %v2590_v47 = vpop.eup %2589 }
0x2150   :  { %1612 = vrot.lane.b32.xlu0 %v2590_v47, %s2759_s5 }
0x21c2   :  { %v1613_v48 = vpop.permute.xlu0 %1612 }
0x21c3   :  { %v1615_v49 = vmul.f32 %v2588_v37, %v1613_v48 }
0x21c5   :  { %1619 = vrot.lane.b32.xlu1 %v1615_v49, %s2760_s13 }
0x2237   :  { %v1620_v50 = vpop.permute.xlu1 %1619 }
0x2238   :  { %2355 = vmatmul.mubr.msk.f32.vlgmr.msra.gmra.mrb[14].mxu1 %vm100_vm1, %v1620_v50 }
0x2239   :  { %2490 = vmatpush3.bf16.msra.mxu1 %v3004_v36  ;;  %2376 = vmatprep.mubr.msk.f32.mxu1 %vm2757_vm0, %v2758_v1 }
0x223a   :  { %2491 = vmatprep.subr.bf16.mxu1 %v2756_v0 }
0x223d   :  { %2493 = vmatpush3.bf16.msra.mxu1 %v3008_v39 }
0x230b   :  { %v1689_v51 = vpop.f32.mrb[14].mxu1 }
0x230c   :  { %v1693_v52 = vadd.f32 %v1689_v51, %v1082_v5  ;;  %v2356_v53 = vpop.f32.mrb[15].mxu1  ;;  %v2084_v5 = vld [vmem:[%s3155_s6] ss:$0 sm:$0xff] }
0x230e   :  { %v2076_v7 = vmul.f32 -1.442695, %v1693_v52 }
0x2310   :  { %2591 = vpow2.f32 %v2076_v7 }
0x231a   :  { %v2592_v54 = vpop.eup %2591 }
0x231b   :  { %v1697_v55 = vadd.f32 1.0, %v2592_v54 }
0x231d   :  { %2593 = vrcp.f32 %v1697_v55 }
0x2327   :  { %v2594_v56 = vpop.eup %2593 }
0x2328   :  { %v1700_v36 = vmul.f32 2.0, %v2594_v56  ;;  %v1702_v39 = vmul.f32 %v2594_v56, %v1609_v24  ;;  %v2498_v24 = vpack.c.bf16 %v1928_v45, %v1927_v43 }
0x232a   :  { %v2077_v57 = vadd.f32 -1.0, %v1700_v36 }
0x232c   :  { %1704 = vrot.lane.b32.xlu0 %v2077_v57, %s2759_s5 }
0x239e   :  { %v1705_v58 = vpop.permute.xlu0 %1704 }
0x239f   :  { %v1707_v59 = vmul.f32 %v2594_v56, %v1705_v58 }
0x23a1   :  { %1709 = vrot.lane.b32.xlu1 %v1707_v59, %s2760_s13 }
0x2413   :  { %v1710_v60 = vpop.permute.xlu1 %1709 }
0x2414   :  { %v1712_v23 = vadd.f32 %v1710_v60, %v1702_v39 }
0x2416   :  { %2595 = vtanh.f32 %v1712_v23 }
0x2420   :  { %v2596_v61 = vpop.eup %2595 }
0x2421   :  { %1715 = vrot.lane.b32.xlu0 %v2596_v61, %s2759_s5 }
0x2493   :  { %v1716_v20 = vpop.permute.xlu0 %1715 }
0x2494   :  { %v1718_v62 = vmul.f32 %v2594_v56, %v1716_v20 }
0x2496   :  { %1722 = vrot.lane.b32.xlu1 %v1718_v62, %s2760_s13 }
0x2508   :  { %v1723_v63 = vpop.permute.xlu1 %1722 }
0x2509   :  { %2366 = vmatmul.mubr.msk.f32.vlgmr.msra.gmra.mrb[20].mxu0 %vm100_vm1, %v1723_v63 }
0x250a   :  { %2387 = vmatprep.mubr.msk.f32.mxu0 %vm2757_vm0, %v2758_v1  ;;  %2496 = vmatpush3.bf16.msra.mxu0 %v2495_v44 }
0x250b   :  { %2497 = vmatprep.subr.bf16.mxu0 %v2756_v0 }
0x250e   :  { %2499 = vmatpush3.bf16.msra.mxu0 %v2498_v24 }
0x25dc   :  { %v1792_v3 = vpop.f32.mrb[20].mxu0 }
0x25dd   :  { %v1796_v4 = vadd.f32 %v1792_v3, %v1087_v2  ;;  %v2367_v6 = vpop.f32.mrb[21].mxu0 }
0x25df   :  { %v2079_v8 = vmul.f32 -1.442695, %v1796_v4 }
0x25e1   :  { %2597 = vpow2.f32 %v2079_v8 }
0x25eb   :  { %v2598_v9 = vpop.eup %2597 }
0x25ec   :  { %v1800_v10 = vadd.f32 1.0, %v2598_v9 }
0x25ee   :  { %2599 = vrcp.f32 %v1800_v10 }
0x25f8   :  { %v2600_v11 = vpop.eup %2599 }
0x25f9   :  { %v1803_v12 = vmul.f32 2.0, %v2600_v11  ;;  %v1805_v1 = vmul.f32 %v2600_v11, %v1712_v23 }
0x25fb   :  { %v2080_v13 = vadd.f32 -1.0, %v1803_v12 }
0x25fd   :  { %1807 = vrot.lane.b32.xlu0 %v2080_v13, %s2759_s5 }
0x266f   :  { %v1808_v14 = vpop.permute.xlu0 %1807 }
0x2670   :  { %v1810_v15 = vmul.f32 %v2600_v11, %v1808_v14 }
0x2672   :  { %1812 = vrot.lane.b32.xlu1 %v1810_v15, %s2760_s13 }
0x26e4   :  { %v1813_v16 = vpop.permute.xlu1 %1812 }
0x26e5   :  { %v1815_v41 = vadd.f32 %v1813_v16, %v1805_v1 }
0x26e7   :  { %2601 = vtanh.f32 %v1815_v41 }
0x26f1   :  { %v2602_v18 = vpop.eup %2601 }
0x26f2   :  { %1818 = vrot.lane.b32.xlu0 %v2602_v18, %s2759_s5 }
0x2764   :  { %v1819_v21 = vpop.permute.xlu0 %1818 }
0x2765   :  { %v1821_v22 = vmul.f32 %v2600_v11, %v1819_v21 }
0x2767   :  { %1825 = vrot.lane.b32.xlu1 %v1821_v22, %s2760_s13 }
0x27d9   :  { %v1826_v19 = vpop.permute.xlu1 %1825 }
0x27da   :  { %2377 = vmatmul.mubr.msk.f32.vlgmr.msra.gmra.mrb[16].mxu1 %vm100_vm1, %v1826_v19 }
0x28ad   :  { %v1895_v26 = vpop.f32.mrb[16].mxu1 }
0x28ae   :  { %v1899_v27 = vadd.f32 %v1895_v26, %v1092_v25  ;;  %v2378_v28 = vpop.f32.mrb[17].mxu1 }
0x28b0   :  { %v2082_v29 = vmul.f32 -1.442695, %v1899_v27 }
0x28b2   :  { %2603 = vpow2.f32 %v2082_v29 }
0x28bc   :  { %v2604_v30 = vpop.eup %2603 }
0x28bd   :  { %v1903_v31 = vadd.f32 1.0, %v2604_v30 }
0x28bf   :  { %2605 = vrcp.f32 %v1903_v31 }
0x28c9   :  { %v2606_v32 = vpop.eup %2605 }
0x28ca   :  { %v1906_v33 = vmul.f32 2.0, %v2606_v32  ;;  %v1908_v17 = vmul.f32 %v2606_v32, %v1815_v41 }
0x28cc   :  { %v2083_v34 = vadd.f32 -1.0, %v1906_v33 }
0x28ce   :  { %1910 = vrot.lane.b32.xlu0 %v2083_v34, %s2759_s5 }
0x2940   :  { %v1911_v35 = vpop.permute.xlu0 %1910 }
0x2941   :  { %v1913_v37 = vmul.f32 %v2606_v32, %v1911_v35 }
0x2943   :  { %1915 = vrot.lane.b32.xlu1 %v1913_v37, %s2760_s13 }
0x29b5   :  { %v1916_v38 = vpop.permute.xlu1 %1915 }
0x29b6   :  { %v1918_v46 = vadd.f32 %v1916_v38, %v1908_v17 }
0x29b8   :  { %2607 = vtanh.f32 %v1918_v46 }
0x29c2   :  { %v2608_v47 = vpop.eup %2607 }
0x29c3   :  { %1921 = vrot.lane.b32.xlu0 %v2608_v47, %s2759_s5 }
0x2a35   :  { %v1922_v48 = vpop.permute.xlu0 %1921 }
0x2a36   :  { %v1924_v49 = vmul.f32 %v2606_v32, %v1922_v48 }
0x2a38   :  { %1937 = vrot.lane.b32.xlu1 %v1924_v49, %s2760_s13 }
0x2aaa   :  { %v1938_v50 = vpop.permute.xlu1 %1937 }
0x2aab   :  { %2388 = vmatmul.mubr.msk.f32.vlgmr.msra.gmra.mrb[22].mxu0 %vm100_vm1, %v1938_v50 }
0x2b7e   :  { %v2007_v51 = vpop.f32.mrb[22].mxu0 }
0x2b7f   :  { %v2008_v52 = vadd.f32 %v2084_v5, %v2007_v51  ;;  %v2389_v0 = vpop.f32.mrb[23].mxu0 }
0x2b81   :  { %2011 = vst [vmem:[#allocation13] sm:$0xff] %v2008_v52 }
0x2b82   :  { %2730 = shalt.err (!%p2727_p2)
}
0x2b83   :  { %s2731_s22 = scalar_lea.hbm %s3156_s7, 128 }
0x2b84   :  { %p2732_p3 = scmp.ne.s32.totalorder %s3156_s7, %s2731_s22  ;;  %p2735_p4 = scmp.lt.u32.totalorder %s2731_s22, %s3156_s7 }
0x2b86   :  { %p2737_p5 = pnand %p2735_p4, %p2732_p3 }
0x2b88   :  { %2740 = shalt.err (!%p2737_p5)
}
0x2b89   :  { %2021 = dma.vmem_to_hbm [thread:$0]  %s2019_s18, 128, %s3156_s7, [#allocation6]  }
0x2b8a   :  { %2747 = dma.done.wait [#allocation6], 128  }
0x2b8b   :  { %2748 = vsyncadd [#allocation6], 4294967168 }
0x2b8c   :  { %2025 = vsyncpa [#allocation5], 1 }
0x2b8d   :  { %2026 = vsyncpa [#allocation8], 1 }
0x2b8e   :  { %2027 = vsyncpa [#allocation11], 1 }
0x2b8f   :  { %2028 = vsyncpa [#allocation6], 1 }

</bundles_post_ra>
